<compile_context>
chip_gen: v6e
topology: v6e:2x2x1
jax: 0.10.0
libtpu: 0.0.40
codegen_flags: <defaults>
</compile_context>

<pallas_src>
import jax
import jax.numpy as jnp
from jax.experimental import pallas as pl
from jax.experimental.pallas import tpu as pltpu

C_IN = 80      # squeeze channels
C_MID = 320    # expanded channels
H = W = 14
HW = H * W


def se_block_kernel(xse_ref, w37_ref, b37_ref, xsp_ref, w38_ref, o_ref):
    """Fused: gate = sigmoid(W37 @ xse + b37); out = W38_blk @ (xsp * gate).

    xse_ref : (80, 1)        f32   squeeze input  (x114)
    w37_ref : (320, 80)      f32   conv2d37 weight (Cout, Cin)
    b37_ref : (320, 1)       f32   conv2d37 bias
    xsp_ref : (320, 196)     f32   spatial input (x111 as C x HW)
    w38_ref : (Cb, 320)      bf16  conv2d38 weight block (Cout_blk, Cin)
    o_ref   : (Cb, 196)      f32   output block (Cout_blk x HW)
    """
    # Tiny 1x1 conv on the (1,1) squeeze tensor == small matmul (MXU), then
    # sigmoid on EUP.  Recomputed per Cout block -- negligible (320x80x1).
    gate = jnp.dot(w37_ref[...], xse_ref[...],
                   preferred_element_type=jnp.float32) + b37_ref[...]
    gate = jax.nn.sigmoid(gate)                       # (320, 1) f32

    # Channel-wise gating (lane-broadcast over HW) fused with the bf16
    # downcast in one expression -> no standalone f32 temp pass.
    scaled = (xsp_ref[...] * gate).astype(jnp.bfloat16)   # (320, 196) bf16

    # Second 1x1 conv == channels matmul. bf16 operands, f32 accumulation.
    o_ref[...] = jnp.dot(w38_ref[...], scaled,
                         preferred_element_type=jnp.float32)


def prepare_w38(w38):
    """One-time parameter prep: (320,320,1,1) f32 -> (320,320) bf16.

    Do this at parameter-load time, NOT per forward call -- the cast is a
    standalone HBM pass bigger than the fused kernel itself.
    """
    return w38.reshape(C_MID, C_MID).astype(jnp.bfloat16)


def _num_cout_blocks():
    """2-way Cout split only where there are 2 TensorCores per chip (v7x)."""
    try:
        kind = jax.devices()[0].device_kind.lower()
    except Exception:
        return 1
    return 2 if ("v7" in kind or "7x" in kind) else 1


def se_block(x114, x111, w37, b37, w38_bf16, *, cout_blocks=None):
    """x114: (1, 80, 1, 1), x111: (1, 320, 14, 14) -> (1, 320, 14, 14).

    `w38_bf16` must be the pre-converted (320, 320) bf16 weight from
    `prepare_w38` (hoisted out of the hot path).
    """
    if cout_blocks is None:
        cout_blocks = _num_cout_blocks()
    assert C_MID % cout_blocks == 0 and (C_MID // cout_blocks) % 8 == 0
    cb = C_MID // cout_blocks

    # --- glue: all pure reshapes (contiguous for N=1; no transposes) ---
    xse = x114.reshape(C_IN, 1)                       # (80, 1)
    xsp = x111.reshape(C_MID, HW)                     # (320, 196) = NCHW flat
    w37_m = w37.reshape(C_MID, C_IN)                  # (320, 80) = (Cout, Cin)
    b37_m = b37.reshape(C_MID, 1)                     # (320, 1)

    bytes_accessed = (
        4 * (xse.size + w37_m.size + b37_m.size + xsp.size + C_MID * HW)
        + 2 * w38_bf16.size
    )

    grid_spec = pltpu.PrefetchScalarGridSpec(
        num_scalar_prefetch=0,
        grid=(cout_blocks,),
        in_specs=[
            pl.BlockSpec((C_IN, 1), lambda i: (0, 0)),        # xse  (full)
            pl.BlockSpec((C_MID, C_IN), lambda i: (0, 0)),    # w37  (full)
            pl.BlockSpec((C_MID, 1), lambda i: (0, 0)),       # b37  (full)
            pl.BlockSpec((C_MID, HW), lambda i: (0, 0)),      # xsp  (full)
            pl.BlockSpec((cb, C_MID), lambda i: (i, 0)),      # w38  (Cout blk)
        ],
        out_specs=pl.BlockSpec((cb, HW), lambda i: (i, 0)),   # out  (Cout blk)
    )

    out_flat = pl.pallas_call(
        se_block_kernel,
        out_shape=jax.ShapeDtypeStruct((C_MID, HW), jnp.float32),
        grid_spec=grid_spec,
        compiler_params=pltpu.CompilerParams(
            dimension_semantics=("parallel",)),
        cost_estimate=pl.CostEstimate(
            flops=2 * HW * C_MID * C_MID + 2 * C_MID * C_IN,
            transcendentals=C_MID,
            bytes_accessed=bytes_accessed,
        ),
    )(xse, w37_m, b37_m, xsp, w38_bf16)

    # (C, HW) -> NCHW: free reshape, no transpose.
    return out_flat.reshape(1, C_MID, H, W)


def reference(x114, x111, w37, b37, w38):
    """Pure-JAX f32 reference of the PyTorch forward (1x1 convs as einsums)."""
    x115 = jnp.einsum('oc,nchw->nohw', w37.reshape(C_MID, C_IN), x114) \
        + b37.reshape(1, C_MID, 1, 1)
    x116 = jax.nn.sigmoid(x115)
    x117 = x116 * x111
    x118 = jnp.einsum('oc,nchw->nohw', w38.reshape(C_MID, C_MID), x117)
    return x118


if __name__ == "__main__":
    key = jax.random.PRNGKey(0)
    k1, k2, k3, k4, k5 = jax.random.split(key, 5)

    # Inputs (shapes implied by the module's forward).
    x114 = jax.random.normal(k1, (1, C_IN, 1, 1), dtype=jnp.float32)
    x111 = jax.random.normal(k2, (1, C_MID, H, W), dtype=jnp.float32)

    # Deterministic parameter init (shapes from the module's __init__).
    fan_in37 = C_IN
    w37 = jax.random.uniform(k3, (C_MID, C_IN, 1, 1), dtype=jnp.float32,
                             minval=-1.0, maxval=1.0) / jnp.sqrt(fan_in37)
    b37 = jax.random.uniform(k4, (C_MID,), dtype=jnp.float32,
                             minval=-1.0, maxval=1.0) / jnp.sqrt(fan_in37)
    fan_in38 = C_MID
    w38 = jax.random.uniform(k5, (C_MID, C_MID, 1, 1), dtype=jnp.float32,
                             minval=-1.0, maxval=1.0) / jnp.sqrt(fan_in38)

    # One-time parameter prep (outside the hot path).
    w38_bf16 = jax.block_until_ready(prepare_w38(w38))

    out = se_block(x114, x111, w37, b37, w38_bf16)
    jax.block_until_ready(out)

    ref = reference(x114, x111, w37, b37, w38)
    assert out.shape == (1, C_MID, H, W)
    # bf16 MXU operands (f32 accumulation) -> loosen tolerance vs. f32 ref.
    assert jnp.allclose(out, ref, atol=2e-2, rtol=2e-2)

    print("KERNEL_OK")
</pallas_src>

<mosaic_0001>
module attributes {stable_mosaic.version = 11 : i64} {
  func.func @se_block_kernel(%arg0: i32, %arg1: memref<80x1xf32, #tpu.memory_space<vmem>>, %arg2: memref<320x80xf32, #tpu.memory_space<vmem>>, %arg3: memref<320x1xf32, #tpu.memory_space<vmem>>, %arg4: memref<320x196xf32, #tpu.memory_space<vmem>>, %arg5: memref<320x320xbf16, #tpu.memory_space<vmem>>, %arg6: memref<320x196xf32, #tpu.memory_space<vmem>>) attributes {dimension_semantics = [#tpu.dimension_semantics<parallel>], iteration_bounds = array<i64: 1>, scalar_prefetch = 0 : i64, scratch_operands = 0 : i64, tpu.core_type = #tpu.core_type<tc>, window_params = [{pipeline_mode = #tpu.pipeline_mode<synchronous>, transform_indices = @transform_0, window_bounds = array<i64: 80, 1>}, {pipeline_mode = #tpu.pipeline_mode<synchronous>, transform_indices = @transform_1, window_bounds = array<i64: 320, 80>}, {pipeline_mode = #tpu.pipeline_mode<synchronous>, transform_indices = @transform_2, window_bounds = array<i64: 320, 1>}, {pipeline_mode = #tpu.pipeline_mode<synchronous>, transform_indices = @transform_3, window_bounds = array<i64: 320, 196>}, {transform_indices = @transform_4, window_bounds = array<i64: 320, 320>}, {transform_indices = @transform_5, window_bounds = array<i64: 320, 196>}]} {
    %c0 = arith.constant 0 : index
    %c0_0 = arith.constant 0 : index
    %0 = vector.load %arg2[%c0, %c0_0] : memref<320x80xf32, #tpu.memory_space<vmem>>, vector<320x80xf32>
    %c0_1 = arith.constant 0 : index
    %c0_2 = arith.constant 0 : index
    %1 = vector.load %arg1[%c0_1, %c0_2] : memref<80x1xf32, #tpu.memory_space<vmem>>, vector<80x1xf32>
    %cst = arith.constant dense<0.000000e+00> : vector<320x1xf32>
    %2 = tpu.matmul %0, %1, %cst {dimension_numbers = #tpu.dot_dimension_numbers<[1], [0], [0], [1], [0, 0, 1, 1], [], []>} : vector<320x80xf32>, vector<80x1xf32>, vector<320x1xf32> -> vector<320x1xf32>
    %c0_3 = arith.constant 0 : index
    %c0_4 = arith.constant 0 : index
    %3 = vector.load %arg3[%c0_3, %c0_4] : memref<320x1xf32, #tpu.memory_space<vmem>>, vector<320x1xf32>
    %4 = arith.addf %2, %3 : vector<320x1xf32>
    %5 = arith.negf %4 : vector<320x1xf32>
    %6 = math.exp %5 : vector<320x1xf32>
    %cst_5 = arith.constant 1.000000e+00 : f32
    %7 = vector.broadcast %cst_5 : f32 to vector<320x1xf32>
    %8 = arith.addf %7, %6 : vector<320x1xf32>
    %9 = arith.divf %7, %8 : vector<320x1xf32>
    %c0_6 = arith.constant 0 : index
    %c0_7 = arith.constant 0 : index
    %10 = vector.load %arg4[%c0_6, %c0_7] : memref<320x196xf32, #tpu.memory_space<vmem>>, vector<320x196xf32>
    %11 = vector.broadcast %9 : vector<320x1xf32> to vector<320x196xf32>
    %12 = arith.mulf %10, %11 : vector<320x196xf32>
    %13 = arith.truncf %12 : vector<320x196xf32> to vector<320x196xbf16>
    %c0_8 = arith.constant 0 : index
    %c0_9 = arith.constant 0 : index
    %14 = vector.load %arg5[%c0_8, %c0_9] : memref<320x320xbf16, #tpu.memory_space<vmem>>, vector<320x320xbf16>
    %cst_10 = arith.constant dense<0.000000e+00> : vector<320x196xf32>
    %15 = tpu.matmul %14, %13, %cst_10 {dimension_numbers = #tpu.dot_dimension_numbers<[1], [0], [0], [1], [0, 0, 1, 1], [], []>} : vector<320x320xbf16>, vector<320x196xbf16>, vector<320x196xf32> -> vector<320x196xf32>
    %c0_11 = arith.constant 0 : index
    %c0_12 = arith.constant 0 : index
    %16 = vector.load %arg6[%c0_11, %c0_12] : memref<320x196xf32, #tpu.memory_space<vmem>>, vector<320x196xf32>
    tpu.vector_store %arg6[%c0_11, %c0_12], %15 {strides = array<i32>} : memref<320x196xf32, #tpu.memory_space<vmem>>, vector<320x196xf32>,
    return
  }
  func.func @transform_0(%arg0: i32) -> (i32, i32) {
    %c0_i32 = arith.constant 0 : i32
    %c0_i32_0 = arith.constant 0 : i32
    %c0_i32_1 = arith.constant 0 : i32
    return %c0_i32, %c0_i32_0 : i32, i32
  }
  func.func @transform_1(%arg0: i32) -> (i32, i32) {
    %c0_i32 = arith.constant 0 : i32
    %c0_i32_0 = arith.constant 0 : i32
    %c0_i32_1 = arith.constant 0 : i32
    return %c0_i32, %c0_i32_0 : i32, i32
  }
  func.func @transform_2(%arg0: i32) -> (i32, i32) {
    %c0_i32 = arith.constant 0 : i32
    %c0_i32_0 = arith.constant 0 : i32
    %c0_i32_1 = arith.constant 0 : i32
    return %c0_i32, %c0_i32_0 : i32, i32
  }
  func.func @transform_3(%arg0: i32) -> (i32, i32) {
    %c0_i32 = arith.constant 0 : i32
    %c0_i32_0 = arith.constant 0 : i32
    %c0_i32_1 = arith.constant 0 : i32
    return %c0_i32, %c0_i32_0 : i32, i32
  }
  func.func @transform_4(%arg0: i32) -> (i32, i32) {
    %c0_i32 = arith.constant 0 : i32
    %c0_i32_0 = arith.constant 0 : i32
    return %arg0, %c0_i32 : i32, i32
  }
  func.func @transform_5(%arg0: i32) -> (i32, i32) {
    %c0_i32 = arith.constant 0 : i32
    %c0_i32_0 = arith.constant 0 : i32
    return %arg0, %c0_i32 : i32, i32
  }
}

</mosaic_0001>

<bundles_post_ra>
// kernel: tpu_custom_call.1
= control target key start
LH: loop header
LB: loop body
LE: loop exit
PB: predicated region body
PF: predicated region fallthrough
CT: control target
= control target key end

     0   :  { %vm111_vm0 = vcmask 654336   ;;  %v2682_v50 = vmov 0   ;;  %vm1517_vm1 = vcmask 523264   ;;  %vm2045_vm2 = vcmask 556032   ;;  %s3844_s0 = inlined_call_operand.vmem [shape: f32[80,1], index: 0, kind: input, shape index: {}]   ;;  %s3845_s1 = inlined_call_operand.vmem [shape: f32[320,80], index: 1, kind: input, shape index: {}]   ;;  %s3846_s2 = inlined_call_operand.vmem [shape: f32[320,1], index: 2, kind: input, shape index: {}]   ;;  %s3847_s4 = inlined_call_operand.vmem [shape: bf16[320,320], index: 4, kind: input, shape index: {}]   ;;  %s3848_s3 = inlined_call_operand.vmem [shape: f32[320,196], index: 3, kind: input, shape index: {}]   ;;  %s3849_s5 = inlined_call_operand.vmem [shape: f32[320,196], index: 5, kind: output, shape index: {}]  }
   0x1   :  { %v70_v0 = vld [vmem:[%s3844_s0 + $0x48] sm:$0xff]  ;;  %v69_v1 = vld [vmem:[%s3844_s0 + $0x40] sm:$0xff]  ;;  %v68_v2 = vld [vmem:[%s3844_s0 + $0x38] sm:$0xff]  ;;  %2440 = vset.pattern.permute.xlu1 %v2682_v50  ;;  %2441 = vset.pattern.permute.xlu0 %v2682_v50 }
   0x2   :  { %2339 = vmatprep.subr.mxu0 %v70_v0  ;;  %2419 = vmatprep.subr.mxu1 %v70_v0  ;;  %v67_v3 = vld [vmem:[%s3844_s0 + $0x30] sm:$0xff]  ;;  %v66_v4 = vld [vmem:[%s3844_s0 + $0x28] sm:$0xff]  ;;  %v65_v5 = vld [vmem:[%s3844_s0 + $0x20] sm:$0xff] }
   0x3   :  { %2340 = vmatpush3.msra.mxu0 %v70_v0  ;;  %2429 = vmatpush3.msra.mxu1 %v70_v0  ;;  %v64_v6 = vld [vmem:[%s3844_s0 + $0x18] sm:$0xff]  ;;  %v63_v7 = vld [vmem:[%s3844_s0 + $0x10] sm:$0xff]  ;;  %v62_v8 = vld [vmem:[%s3844_s0 + $0x8] sm:$0xff] }
   0x4   :  { %2341 = vmatprep.subr.mxu0 %v69_v1  ;;  %2420 = vmatprep.subr.mxu1 %v69_v1  ;;  %v61_v9 = vld [vmem:[%s3844_s0] sm:$0xff]  ;;  %v22_v12 = vld [vmem:[%s3845_s1 + $0x8] sm:$0xff]  ;;  %v23_v14 = vld [vmem:[%s3845_s1 + $0x10] sm:$0xff] }
   0x5   :  { %2342 = vmatpush3.msra.mxu0 %v69_v1  ;;  %2430 = vmatpush3.msra.mxu1 %v69_v1  ;;  %v21_v10 = vld [vmem:[%s3845_s1] sm:$0xff]  ;;  %v30_v13 = vld [vmem:[%s3845_s1 + $0x48] sm:$0xff]  ;;  %v31_v15 = vld [vmem:[%s3845_s1 + $0x50] sm:$0xff] }
   0x6   :  { %2343 = vmatprep.subr.mxu0 %v68_v2  ;;  %2421 = vmatprep.subr.mxu1 %v68_v2  ;;  %v29_v11 = vld [vmem:[%s3845_s1 + $0x40] sm:$0xff]  ;;  %v24_v16 = vld [vmem:[%s3845_s1 + $0x18] sm:$0xff]  ;;  %v26_v20 = vld [vmem:[%s3845_s1 + $0x28] sm:$0xff] }
   0x7   :  { %2344 = vmatpush3.msra.mxu0 %v68_v2  ;;  %2431 = vmatpush3.msra.mxu1 %v68_v2  ;;  %v32_v17 = vld [vmem:[%s3845_s1 + $0x58] sm:$0xff]  ;;  %v25_v18 = vld [vmem:[%s3845_s1 + $0x20] sm:$0xff]  ;;  %v34_v21 = vld [vmem:[%s3845_s1 + $0x68] sm:$0xff] }
   0x8   :  { %2345 = vmatprep.subr.mxu0 %v67_v3  ;;  %2422 = vmatprep.subr.mxu1 %v67_v3  ;;  %v33_v19 = vld [vmem:[%s3845_s1 + $0x60] sm:$0xff]  ;;  %v35_v22 = vld [vmem:[%s3845_s1 + $0x70] sm:$0xff]  ;;  %v36_v24 = vld [vmem:[%s3845_s1 + $0x78] sm:$0xff] }
   0x9   :  { %2346 = vmatpush3.msra.mxu0 %v67_v3  ;;  %2432 = vmatpush3.msra.mxu1 %v67_v3  ;;  %v27_v23 = vld [vmem:[%s3845_s1 + $0x30] sm:$0xff]  ;;  %v28_v25 = vld [vmem:[%s3845_s1 + $0x38] sm:$0xff]  ;;  %v37_v26 = vld [vmem:[%s3845_s1 + $0x80] sm:$0xff] }
   0xa   :  { %2347 = vmatprep.subr.mxu0 %v66_v4  ;;  %2423 = vmatprep.subr.mxu1 %v66_v4  ;;  %v38_v27 = vld [vmem:[%s3845_s1 + $0x88] sm:$0xff]  ;;  %v39_v28 = vld [vmem:[%s3845_s1 + $0x90] sm:$0xff]  ;;  %v40_v29 = vld [vmem:[%s3845_s1 + $0x98] sm:$0xff] }
   0xb   :  { %2348 = vmatpush3.msra.mxu0 %v66_v4  ;;  %2433 = vmatpush3.msra.mxu1 %v66_v4  ;;  %v41_v30 = vld [vmem:[%s3845_s1 + $0xa0] sm:$0xff]  ;;  %v42_v31 = vld [vmem:[%s3845_s1 + $0xa8] sm:$0xff]  ;;  %v43_v32 = vld [vmem:[%s3845_s1 + $0xb0] sm:$0xff] }
   0xc   :  { %2349 = vmatprep.subr.mxu0 %v65_v5  ;;  %2424 = vmatprep.subr.mxu1 %v65_v5  ;;  %v44_v33 = vld [vmem:[%s3845_s1 + $0xb8] sm:$0xff]  ;;  %v45_v34 = vld [vmem:[%s3845_s1 + $0xc0] sm:$0xff]  ;;  %v46_v35 = vld [vmem:[%s3845_s1 + $0xc8] sm:$0xff] }
   0xd   :  { %2350 = vmatpush3.msra.mxu0 %v65_v5  ;;  %2434 = vmatpush3.msra.mxu1 %v65_v5  ;;  %v47_v36 = vld [vmem:[%s3845_s1 + $0xd0] sm:$0xff]  ;;  %v48_v37 = vld [vmem:[%s3845_s1 + $0xd8] sm:$0xff]  ;;  %v49_v38 = vld [vmem:[%s3845_s1 + $0xe0] sm:$0xff] }
   0xe   :  { %2351 = vmatprep.subr.mxu0 %v64_v6  ;;  %2425 = vmatprep.subr.mxu1 %v64_v6  ;;  %v50_v39 = vld [vmem:[%s3845_s1 + $0xe8] sm:$0xff]  ;;  %v51_v40 = vld [vmem:[%s3845_s1 + $0xf0] sm:$0xff]  ;;  %v52_v41 = vld [vmem:[%s3845_s1 + $0xf8] sm:$0xff] }
   0xf   :  { %2352 = vmatpush3.msra.mxu0 %v64_v6  ;;  %2435 = vmatpush3.msra.mxu1 %v64_v6  ;;  %v53_v42 = vld [vmem:[%s3845_s1 + $0x100] sm:$0xff]  ;;  %v54_v43 = vld [vmem:[%s3845_s1 + $0x108] sm:$0xff]  ;;  %v55_v44 = vld [vmem:[%s3845_s1 + $0x110] sm:$0xff] }
  0x10   :  { %2353 = vmatprep.subr.mxu0 %v63_v7  ;;  %2426 = vmatprep.subr.mxu1 %v63_v7  ;;  %v56_v45 = vld [vmem:[%s3845_s1 + $0x118] sm:$0xff]  ;;  %v57_v46 = vld [vmem:[%s3845_s1 + $0x120] sm:$0xff]  ;;  %v58_v47 = vld [vmem:[%s3845_s1 + $0x128] sm:$0xff] }
  0x11   :  { %2354 = vmatpush3.msra.mxu0 %v63_v7  ;;  %2436 = vmatpush3.msra.mxu1 %v63_v7  ;;  %v59_v48 = vld [vmem:[%s3845_s1 + $0x130] sm:$0xff]  ;;  %v60_v49 = vld [vmem:[%s3845_s1 + $0x138] sm:$0xff]  ;;  %v72_v51 = vld [vmem:[%s3846_s2 + $0x8] sm:$0xff] }
  0x12   :  { %2355 = vmatprep.subr.mxu0 %v62_v8  ;;  %2427 = vmatprep.subr.mxu1 %v62_v8  ;;  %v80_v52 = vld [vmem:[%s3846_s2 + $0x48] sm:$0xff]  ;;  %v71_v55 = vld [vmem:[%s3846_s2] sm:$0xff]  ;;  %v82_v0 = vld [vmem:[%s3846_s2 + $0x58] sm:$0xff] }
  0x13   :  { %2356 = vmatpush3.msra.mxu0 %v62_v8  ;;  %2437 = vmatpush3.msra.mxu1 %v62_v8  ;;  %v79_v56 = vld [vmem:[%s3846_s2 + $0x40] sm:$0xff]  ;;  %v81_v3 = vld [vmem:[%s3846_s2 + $0x50] sm:$0xff]  ;;  %v74_v6 = vld [vmem:[%s3846_s2 + $0x18] sm:$0xff] }
  0x14   :  { %2357 = vmatprep.subr.mxu0 %v61_v9  ;;  %2428 = vmatprep.subr.mxu1 %v61_v9 }
  0x15   :  { %2358 = vmatpush3.msra.mxu0 %v61_v9  ;;  %2438 = vmatpush3.msra.mxu1 %v61_v9 }
  0x16   :  { %2359 = vmatprep.mubr.msk.f32.mxu0 %vm111_vm0, %v21_v10  ;;  %2371 = vmatprep.mubr.msk.f32.mxu1 %vm111_vm0, %v29_v11  ;;  %v76_v10 = vld [vmem:[%s3846_s2 + $0x28] sm:$0xff] }
  0x17   :  { %2360 = vmatmul.mubr.msk.f32.vlgmr.msra.gmra.mxu0 %vm111_vm0, %v22_v12  ;;  %2372 = vmatmul.mubr.msk.f32.vlgmr.msra.gmra.mxu1 %vm111_vm0, %v30_v13  ;;  %v84_v13 = vld [vmem:[%s3846_s2 + $0x68] sm:$0xff] }
  0x18   :  { %2362 = vmatprep.mubr.msk.f32.mxu0 %vm111_vm0, %v23_v14  ;;  %2374 = vmatprep.mubr.msk.f32.mxu1 %vm111_vm0, %v31_v15 }
  0x1b   :  { %2363 = vmatmul.mubr.msk.f32.gmra.mxu0 %vm111_vm0, %v24_v16  ;;  %2375 = vmatmul.mubr.msk.f32.gmra.mxu1 %vm111_vm0, %v32_v17 }
  0x1c   :  { %2365 = vmatprep.mubr.msk.f32.mxu0 %vm111_vm0, %v25_v18  ;;  %2377 = vmatprep.mubr.msk.f32.mxu1 %vm111_vm0, %v33_v19  ;;  %v75_v18 = vld [vmem:[%s3846_s2 + $0x20] sm:$0xff] }
  0x1d   :  { %v83_v19 = vld [vmem:[%s3846_s2 + $0x60] sm:$0xff] }
  0x1f   :  { %2366 = vmatmul.mubr.msk.f32.gmra.mxu0 %vm111_vm0, %v26_v20  ;;  %2378 = vmatmul.mubr.msk.f32.gmra.mxu1 %vm111_vm0, %v34_v21 }
  0x20   :  { %2380 = vmatprep.mubr.msk.f32.mxu1 %vm111_vm0, %v35_v22  ;;  %2368 = vmatprep.mubr.msk.f32.mxu0 %vm111_vm0, %v27_v23  ;;  %v73_v22 = vld [vmem:[%s3846_s2 + $0x10] sm:$0xff] }
  0x23   :  { %2381 = vmatmul.mubr.msk.f32.gmra.mxu1 %vm111_vm0, %v36_v24  ;;  %2369 = vmatmul.mubr.msk.f32.gmra.mxu0 %vm111_vm0, %v28_v25 }
  0x24   :  { %2383 = vmatprep.mubr.msk.f32.mxu1 %vm111_vm0, %v37_v26  ;;  %1843 = vmatprep.mubr.bf16.mxu0 %v2682_v50  ;;  %v86_v26 = vld [vmem:[%s3846_s2 + $0x78] sm:$0xff] }
  0x27   :  { %2384 = vmatmul.mubr.msk.f32.gmra.mxu1 %vm111_vm0, %v38_v27 }
  0x28   :  { %2386 = vmatprep.mubr.msk.f32.mxu1 %vm111_vm0, %v39_v28 }
  0x2b   :  { %2387 = vmatmul.mubr.msk.f32.gmra.mxu1 %vm111_vm0, %v40_v29 }
  0x2c   :  { %2389 = vmatprep.mubr.msk.f32.mxu1 %vm111_vm0, %v41_v30  ;;  %v78_v30 = vld [vmem:[%s3846_s2 + $0x38] sm:$0xff] }
  0x2f   :  { %2390 = vmatmul.mubr.msk.f32.gmra.mxu1 %vm111_vm0, %v42_v31 }
  0x30   :  { %2392 = vmatprep.mubr.msk.f32.mxu1 %vm111_vm0, %v43_v32 }
  0x33   :  { %2393 = vmatmul.mubr.msk.f32.gmra.mxu1 %vm111_vm0, %v44_v33 }
  0x34   :  { %2395 = vmatprep.mubr.msk.f32.mxu1 %vm111_vm0, %v45_v34  ;;  %v85_v34 = vld [vmem:[%s3846_s2 + $0x70] sm:$0xff] }
  0x37   :  { %2396 = vmatmul.mubr.msk.f32.gmra.mxu1 %vm111_vm0, %v46_v35 }
  0x38   :  { %2398 = vmatprep.mubr.msk.f32.mxu1 %vm111_vm0, %v47_v36 }
  0x3b   :  { %2399 = vmatmul.mubr.msk.f32.gmra.mxu1 %vm111_vm0, %v48_v37 }
  0x3c   :  { %2401 = vmatprep.mubr.msk.f32.mxu1 %vm111_vm0, %v49_v38 }
  0x3f   :  { %2402 = vmatmul.mubr.msk.f32.gmra.mxu1 %vm111_vm0, %v50_v39 }
  0x40   :  { %2404 = vmatprep.mubr.msk.f32.mxu1 %vm111_vm0, %v51_v40 }
  0x43   :  { %2405 = vmatmul.mubr.msk.f32.gmra.mxu1 %vm111_vm0, %v52_v41 }
  0x44   :  { %2407 = vmatprep.mubr.msk.f32.mxu1 %vm111_vm0, %v53_v42 }
  0x47   :  { %2408 = vmatmul.mubr.msk.f32.gmra.mxu1 %vm111_vm0, %v54_v43 }
  0x48   :  { %2410 = vmatprep.mubr.msk.f32.mxu1 %vm111_vm0, %v55_v44 }
  0x4b   :  { %2411 = vmatmul.mubr.msk.f32.gmra.mxu1 %vm111_vm0, %v56_v45 }
  0x4c   :  { %2413 = vmatprep.mubr.msk.f32.mxu1 %vm111_vm0, %v57_v46 }
  0x4f   :  { %2414 = vmatmul.mubr.msk.f32.gmra.mxu1 %vm111_vm0, %v58_v47 }
  0x50   :  { %2416 = vmatprep.mubr.msk.f32.mxu1 %vm111_vm0, %v59_v48 }
  0x53   :  { %2417 = vmatmul.mubr.msk.f32.gmra.mxu1 %vm111_vm0, %v60_v49 }
  0xd7   :  { %v2361_v53 = vpop.f32.mrf.mxu0  ;;  %v2373_v54 = vpop.f32.mrf.mxu1 }
  0xd8   :  { %v304_v57 = vadd.f32 %v2361_v53, %v72_v51  ;;  %v344_v58 = vadd.f32 %v2373_v54, %v80_v52  ;;  %v77_v51 = vld [vmem:[%s3846_s2 + $0x30] sm:$0xff] }
  0xd9   :  { %v298_v59 = vpop.f32.mrf.mxu0  ;;  %v338_v60 = vpop.f32.mrf.mxu1 }
  0xda   :  { %v2178_v61 = vmul.f32 -1.442695, %v344_v58  ;;  %v299_v62 = vadd.f32 %v298_v59, %v71_v55  ;;  %v339_v63 = vadd.f32 %v338_v60, %v79_v56  ;;  %v2170_v4 = vmul.f32 -1.442695, %v304_v57 }
  0xdb   :  { %v2364_v1 = vpop.f32.mrf.mxu0  ;;  %v2376_v2 = vpop.f32.mrf.mxu1 }
  0xdc   :  { %v2177_v5 = vmul.f32 -1.442695, %v339_v63  ;;  %2522 = vpow2.f32 %v2178_v61  ;;  %v354_v7 = vadd.f32 %v2376_v2, %v82_v0  ;;  %v2169_v11 = vmul.f32 -1.442695, %v299_v62 }
  0xdd   :  { %v308_v8 = vpop.f32.mrf.mxu0  ;;  %v348_v9 = vpop.f32.mrf.mxu1  ;;  %v314_v14 = vadd.f32 %v2364_v1, %v74_v6 }
  0xde   :  { %v349_v12 = vadd.f32 %v348_v9, %v81_v3  ;;  %2524 = vpow2.f32 %v2177_v5  ;;  %v2180_v15 = vmul.f32 -1.442695, %v354_v7  ;;  %v309_v36 = vadd.f32 %v308_v8, %v73_v22  ;;  %v93_v22 = vld [vmem:[%s3846_s2 + $0xb0] sm:$0xff] }
  0xdf   :  { %v2367_v16 = vpop.f32.mrf.mxu0  ;;  %v2379_v17 = vpop.f32.mrf.mxu1  ;;  %2526 = vpow2.f32 %v2170_v4  ;;  %v2172_v31 = vmul.f32 -1.442695, %v314_v14 }
  0xe0   :  { %v2179_v20 = vmul.f32 -1.442695, %v349_v12  ;;  %v324_v21 = vadd.f32 %v2367_v16, %v76_v10  ;;  %2528 = vpow2.f32 %v2180_v15  ;;  %v364_v23 = vadd.f32 %v2379_v17, %v84_v13 }
  0xe1   :  { %v318_v24 = vpop.f32.mrf.mxu0  ;;  %v358_v25 = vpop.f32.mrf.mxu1  ;;  %2530 = vpow2.f32 %v2169_v11  ;;  %v2171_v46 = vmul.f32 -1.442695, %v309_v36 }
  0xe2   :  { %v2174_v27 = vmul.f32 -1.442695, %v324_v21  ;;  %v319_v28 = vadd.f32 %v318_v24, %v75_v18  ;;  %v359_v29 = vadd.f32 %v358_v25, %v83_v19  ;;  %2532 = vpow2.f32 %v2179_v20  ;;  %v94_v18 = vld [vmem:[%s3846_s2 + $0xb8] sm:$0xff]  ;;  %v96_v25 = vld [vmem:[%s3846_s2 + $0xc8] sm:$0xff] }
  0xe3   :  { %v2182_v32 = vmul.f32 -1.442695, %v364_v23  ;;  %v2382_v33 = vpop.f32.mrf.mxu1  ;;  %v2370_v35 = vpop.f32.mrf.mxu0 }
  0xe4   :  { %2534 = vpow2.f32 %v2174_v27  ;;  %v2173_v37 = vmul.f32 -1.442695, %v319_v28  ;;  %v374_v38 = vadd.f32 %v2382_v33, %v86_v26  ;;  %v2181_v39 = vmul.f32 -1.442695, %v359_v29  ;;  %v98_v33 = vld [vmem:[%s3846_s2 + $0xd8] sm:$0xff] }
  0xe5   :  { %2536 = vpow2.f32 %v2182_v32  ;;  %v368_v40 = vpop.f32.mrf.mxu1  ;;  %v334_v41 = vadd.f32 %v2370_v35, %v78_v30  ;;  %v328_v49 = vpop.f32.mrf.mxu0  ;;  %v95_v30 = vld [vmem:[%s3846_s2 + $0xc0] sm:$0xff] }
  0xe6   :  { %2538 = vpow2.f32 %v2173_v37  ;;  %v2184_v42 = vmul.f32 -1.442695, %v374_v38  ;;  %v369_v43 = vadd.f32 %v368_v40, %v85_v34  ;;  %v329_v56 = vadd.f32 %v328_v49, %v77_v51  ;;  %v97_v38 = vld [vmem:[%s3846_s2 + $0xd0] sm:$0xff] }
  0xe7   :  { %2540 = vpow2.f32 %v2172_v31  ;;  %v2951_v44 = vpop.f32.mrf.mxu1  ;;  %v2176_v45 = vmul.f32 -1.442695, %v334_v41 }
  0xe8   :  { %2542 = vpow2.f32 %v2184_v42  ;;  %v2183_v47 = vmul.f32 -1.442695, %v369_v43  ;;  %v2175_v1 = vmul.f32 -1.442695, %v329_v56  ;;  %v100_v42 = vld [vmem:[%s3846_s2 + $0xe8] sm:$0xff] }
  0xe9   :  { %2544 = vpow2.f32 %v2181_v39  ;;  %v2953_v48 = vpop.f32.mrf.mxu1  ;;  %v2523_v52 = vpop.eup %2522 }
  0xea   :  { %2546 = vpow2.f32 %v2183_v47  ;;  %v626_v53 = vadd.f32 1.0, %v2523_v52  ;;  %v99_v52 = vld [vmem:[%s3846_s2 + $0xe0] sm:$0xff] }
  0xeb   :  { %2548 = vpow2.f32 %v2176_v45  ;;  %v2958_v54 = vpop.f32.mrf.mxu1  ;;  %v2525_v55 = vpop.eup %2524 }
  0xec   :  { %2550 = vpow2.f32 %v2171_v46  ;;  %v2527_v57 = vpop.eup %2526  ;;  %v625_v58 = vadd.f32 1.0, %v2525_v55 }
  0xed   :  { %2552 = vrcp.f32 %v626_v53  ;;  %v2960_v59 = vpop.f32.mrf.mxu1  ;;  %v2529_v60 = vpop.eup %2528  ;;  %v618_v17 = vadd.f32 1.0, %v2527_v57 }
  0xee   :  { %v2531_v61 = vpop.eup %2530  ;;  %2554 = vrcp.f32 %v625_v58  ;;  %v628_v62 = vadd.f32 1.0, %v2529_v60 }
  0xef   :  { %v2962_v63 = vpop.f32.mrf.mxu1  ;;  %v2533_v0 = vpop.eup %2532  ;;  %v617_v21 = vadd.f32 1.0, %v2531_v61  ;;  %v102_v61 = vld [vmem:[%s3846_s2 + $0xf8] sm:$0xff] }
  0xf0   :  { %2556 = vrcp.f32 %v628_v62  ;;  %v627_v3 = vadd.f32 1.0, %v2533_v0 }
  0xf1   :  { %v2535_v2 = vpop.eup %2534  ;;  %v2964_v4 = vpop.f32.mrf.mxu1 }
  0xf2   :  { %v2537_v5 = vpop.eup %2536  ;;  %2558 = vrcp.f32 %v627_v3  ;;  %v622_v10 = vadd.f32 1.0, %v2535_v2 }
  0xf3   :  { %v2539_v6 = vpop.eup %2538  ;;  %v630_v7 = vadd.f32 1.0, %v2537_v5  ;;  %v2394_v8 = vpop.f32.mrf.mxu1  ;;  %2560 = vpow2.f32 %v2175_v1 }
  0xf4   :  { %v2541_v9 = vpop.eup %2540  ;;  %v621_v11 = vadd.f32 1.0, %v2539_v6  ;;  %v414_v29 = vadd.f32 %v2394_v8, %v94_v18  ;;  %v101_v6 = vld [vmem:[%s3846_s2 + $0xf0] sm:$0xff] }
  0xf5   :  { %v2543_v12 = vpop.eup %2542  ;;  %2562 = vrcp.f32 %v630_v7  ;;  %v408_v13 = vpop.f32.mrf.mxu1  ;;  %v620_v36 = vadd.f32 1.0, %v2541_v9 }
  0xf6   :  { %v2545_v14 = vpop.eup %2544  ;;  %2564 = vrcp.f32 %v621_v11  ;;  %v632_v15 = vadd.f32 1.0, %v2543_v12  ;;  %v409_v32 = vadd.f32 %v408_v13, %v93_v22  ;;  %v2192_v45 = vmul.f32 -1.442695, %v414_v29  ;;  %v92_v11 = vld [vmem:[%s3846_s2 + $0xa8] sm:$0xff] }
  0xf7   :  { %v2547_v16 = vpop.eup %2546  ;;  %v2397_v19 = vpop.f32.mrf.mxu1  ;;  %2566 = vrcp.f32 %v622_v10  ;;  %v629_v24 = vadd.f32 1.0, %v2545_v14  ;;  %v91_v14 = vld [vmem:[%s3846_s2 + $0xa0] sm:$0xff] }
  0xf8   :  { %v2549_v20 = vpop.eup %2548  ;;  %2568 = vrcp.f32 %v632_v15  ;;  %v631_v28 = vadd.f32 1.0, %v2547_v16  ;;  %v424_v37 = vadd.f32 %v2397_v19, %v96_v25  ;;  %v2191_v47 = vmul.f32 -1.442695, %v409_v32 }
  0xf9   :  { %v2551_v23 = vpop.eup %2550  ;;  %v418_v26 = vpop.f32.mrf.mxu1  ;;  %2570 = vrcp.f32 %v618_v17  ;;  %v624_v31 = vadd.f32 1.0, %v2549_v20  ;;  %v404_v20 = vadd.f32 %v2962_v63, %v92_v11  ;;  %v399_v22 = vadd.f32 %v2964_v4, %v91_v14  ;;  %v89_v63 = vld [vmem:[%s3846_s2 + $0x90] sm:$0xff] }
  0xfa   :  { %v2553_v27 = vpop.eup %2552  ;;  %2572 = vrcp.f32 %v617_v21  ;;  %v619_v39 = vadd.f32 1.0, %v2551_v23  ;;  %v419_v40 = vadd.f32 %v418_v26, %v95_v30  ;;  %v2194_v55 = vmul.f32 -1.442695, %v424_v37  ;;  %v90_v26 = vld [vmem:[%s3846_s2 + $0x98] sm:$0xff] }
  0xfb   :  { %864 = vperm.xlu1 %2440, %v2553_v27   ;;  %v2400_v34 = vpop.f32.mrf.mxu1  ;;  %v2555_v35 = vpop.eup %2554  ;;  %2574 = vrcp.f32 %v629_v24  ;;  %v2190_v29 = vmul.f32 -1.442695, %v404_v20  ;;  %v2189_v32 = vmul.f32 -1.442695, %v399_v22  ;;  %v87_v22 = vld [vmem:[%s3846_s2 + $0x80] sm:$0xff] }
  0xfc   :  { %859 = vperm.xlu0 %2441, %v2555_v35   ;;  %2576 = vrcp.f32 %v631_v28  ;;  %v434_v46 = vadd.f32 %v2400_v34, %v98_v33  ;;  %v2193_v58 = vmul.f32 -1.442695, %v419_v40  ;;  %v389_v35 = vadd.f32 %v2960_v59, %v89_v63 }
  0xfd   :  { %v428_v41 = vpop.f32.mrf.mxu1  ;;  %v2557_v43 = vpop.eup %2556  ;;  %2578 = vrcp.f32 %v624_v31  ;;  %v394_v31 = vadd.f32 %v2958_v54, %v90_v26 }
  0xfe   :  { %v429_v49 = vadd.f32 %v428_v41, %v97_v38  ;;  %2580 = vrcp.f32 %v620_v36  ;;  %v2196_v0 = vmul.f32 -1.442695, %v434_v46 }
  0xff   :  { %874 = vperm.xlu1 %2440, %v2557_v43   ;;  %v2403_v51 = vpop.f32.mrf.mxu1  ;;  %v2559_v53 = vpop.eup %2558  ;;  %2582 = vrcp.f32 %v619_v39  ;;  %v2188_v41 = vmul.f32 -1.442695, %v394_v31 }
 0x100   :  { %v444_v56 = vadd.f32 %v2403_v51, %v100_v42  ;;  %v2561_v57 = vpop.eup %2560  ;;  %869 = vperm.xlu0 %2441, %v2559_v53   ;;  %2584 = vpow2.f32 %v2192_v45  ;;  %v2195_v3 = vmul.f32 -1.442695, %v429_v49  ;;  %v2187_v45 = vmul.f32 -1.442695, %v389_v35 }
 0x101   :  { %v438_v60 = vpop.f32.mrf.mxu1  ;;  %2586 = vpow2.f32 %v2191_v47  ;;  %v623_v10 = vadd.f32 1.0, %v2561_v57  ;;  %v107_v57 = vld [vmem:[%s3846_s2 + $0x120] sm:$0xff] }
 0x102   :  { %v2563_v62 = vpop.eup %2562  ;;  %v439_v1 = vadd.f32 %v438_v60, %v99_v52  ;;  %2588 = vpow2.f32 %v2194_v55  ;;  %v2198_v7 = vmul.f32 -1.442695, %v444_v56  ;;  %v108_v55 = vld [vmem:[%s3846_s2 + $0x128] sm:$0xff] }
 0x103   :  { %v2565_v2 = vpop.eup %2564  ;;  %884 = vperm.xlu1 %2440, %v2563_v62   ;;  %v2406_v5 = vpop.f32.mrf.mxu1  ;;  %2590 = vpow2.f32 %v2193_v58 }
 0x104   :  { %v454_v8 = vadd.f32 %v2406_v5, %v102_v61  ;;  %v2567_v9 = vpop.eup %2566  ;;  %839 = vperm.xlu0 %2441, %v2565_v2   ;;  %2592 = vpow2.f32 %v2196_v0  ;;  %v2197_v15 = vmul.f32 -1.442695, %v439_v1  ;;  %v110_v61 = vld [vmem:[%s3846_s2 + $0x138] sm:$0xff] }
 0x105   :  { %v448_v12 = vpop.f32.mrf.mxu1  ;;  %v2569_v13 = vpop.eup %2568  ;;  %2594 = vpow2.f32 %v2195_v3  ;;  %v109_v3 = vld [vmem:[%s3846_s2 + $0x130] sm:$0xff] }
 0x106   :  { %v449_v16 = vadd.f32 %v448_v12, %v101_v6  ;;  %v2200_v17 = vmul.f32 -1.442695, %v454_v8  ;;  %v2571_v19 = vpop.eup %2570  ;;  %2596 = vpow2.f32 %v2198_v7  ;;  %v106_v6 = vld [vmem:[%s3846_s2 + $0x118] sm:$0xff] }
 0x107   :  { %844 = vperm.xlu1 %2440, %v2567_v9   ;;  %v3002_v18 = vpop.f32.mrf.mxu1  ;;  %v2573_v21 = vpop.eup %2572  ;;  %2598 = vrcp.f32 %v623_v10  ;;  %v105_v10 = vld [vmem:[%s3846_s2 + $0x110] sm:$0xff] }
 0x108   :  { %v2199_v23 = vmul.f32 -1.442695, %v449_v16  ;;  %894 = vperm.xlu0 %2441, %v2569_v13   ;;  %v2575_v25 = vpop.eup %2574  ;;  %2600 = vpow2.f32 %v2197_v15 }
 0x109   :  { %v3006_v24 = vpop.f32.mrf.mxu1  ;;  %v2577_v27 = vpop.eup %2576  ;;  %2602 = vpow2.f32 %v2200_v17  ;;  %v88_v17 = vld [vmem:[%s3846_s2 + $0x88] sm:$0xff] }
 0x10a   :  { %v2579_v4 = vpop.eup %2578  ;;  %2604 = vpow2.f32 %v2199_v23  ;;  %v384_v63 = vadd.f32 %v2951_v44, %v88_v17 }
 0x10b   :  { %879 = vperm.xlu1 %2440, %v2575_v25   ;;  %v3014_v28 = vpop.f32.mrf.mxu1  ;;  %v2581_v30 = vpop.eup %2580  ;;  %2606 = vpow2.f32 %v2190_v29  ;;  %v379_v29 = vadd.f32 %v2953_v48, %v87_v22 }
 0x10c   :  { %889 = vperm.xlu0 %2441, %v2577_v27   ;;  %v2583_v34 = vpop.eup %2582  ;;  %2608 = vpow2.f32 %v2189_v32  ;;  %v474_v14 = vadd.f32 %v3014_v28, %v106_v6 }
 0x10d   :  { %v468_v33 = vpop.f32.mrf.mxu1  ;;  %v2585_v36 = vpop.eup %2584 }
 0x10e   :  { %v2587_v38 = vpop.eup %2586  ;;  %v640_v39 = vadd.f32 1.0, %v2585_v36  ;;  %v2204_v28 = vmul.f32 -1.442695, %v474_v14 }
 0x10f   :  { %854 = vperm.xlu1 %2440, %v2579_v4   ;;  %v2415_v37 = vpop.f32.mrf.mxu1  ;;  %v2589_v40 = vpop.eup %2588  ;;  %v639_v42 = vadd.f32 1.0, %v2587_v38 }
 0x110   :  { %829 = vperm.xlu0 %2441, %v2583_v34   ;;  %v2591_v54 = vpop.eup %2590  ;;  %2610 = vrcp.f32 %v640_v39  ;;  %v642_v46 = vadd.f32 1.0, %v2589_v40  ;;  %v484_v1 = vadd.f32 %v2415_v37, %v108_v55  ;;  %v103_v34 = vld [vmem:[%s3846_s2 + $0x100] sm:$0xff]  ;;  %v2186_v37 = vmul.f32 -1.442695, %v384_v63 }
 0x111   :  { %v478_v43 = vpop.f32.mrf.mxu1  ;;  %v2593_v47 = vpop.eup %2592  ;;  %2612 = vrcp.f32 %v639_v42  ;;  %v641_v49 = vadd.f32 1.0, %v2591_v54  ;;  %v2185_v39 = vmul.f32 -1.442695, %v379_v29  ;;  %v459_v40 = vadd.f32 %v3006_v24, %v103_v34  ;;  %v762_v34 = vld [vmem:[%s3848_s3 + $0xc8] sm:$0xff] }
 0x112   :  { %v2595_v59 = vpop.eup %2594  ;;  %2614 = vrcp.f32 %v642_v46  ;;  %v644_v51 = vadd.f32 1.0, %v2593_v47  ;;  %v479_v7 = vadd.f32 %v478_v43, %v107_v57  ;;  %v2206_v15 = vmul.f32 -1.442695, %v484_v1 }
 0x113   :  { %834 = vperm.xlu1 %2440, %v2581_v30   ;;  %v2418_v52 = vpop.f32.mrf.mxu1  ;;  %v2597_v53 = vpop.eup %2596  ;;  %2616 = vpow2.f32 %v2188_v41  ;;  %v643_v60 = vadd.f32 1.0, %v2595_v59  ;;  %v104_v30 = vld [vmem:[%s3846_s2 + $0x108] sm:$0xff]  ;;  %v2201_v46 = vmul.f32 -1.442695, %v459_v40  ;;  %v761_v40 = vld [vmem:[%s3848_s3 + $0xc0] sm:$0xff] }
 0x114   :  { %819 = vperm.xlu0 %2441, %v2573_v21   ;;  %v2599_v56 = vpop.eup %2598  ;;  %2618 = vpow2.f32 %v2187_v45  ;;  %v646_v0 = vadd.f32 1.0, %v2597_v53  ;;  %v494_v11 = vadd.f32 %v2418_v52, %v110_v61  ;;  %v2205_v20 = vmul.f32 -1.442695, %v479_v7 }
 0x115   :  { %v2601_v58 = vpop.eup %2600  ;;  %2620 = vrcp.f32 %v641_v49  ;;  %v488_v2 = vpop.f32.mrf.mxu1  ;;  %v464_v48 = vadd.f32 %v3002_v18, %v104_v30 }
 0x116   :  { %v2603_v62 = vpop.eup %2602  ;;  %2622 = vrcp.f32 %v644_v51  ;;  %v645_v5 = vadd.f32 1.0, %v2601_v58  ;;  %v489_v13 = vadd.f32 %v488_v2, %v109_v3  ;;  %v2208_v23 = vmul.f32 -1.442695, %v494_v11 }
 0x117   :  { %824 = vperm.xlu1 %2440, %v2571_v19   ;;  %v2605_v8 = vpop.eup %2604  ;;  %v648_v9 = vadd.f32 1.0, %v2603_v62  ;;  %2624 = vrcp.f32 %v643_v60  ;;  %v469_v19 = vadd.f32 %v468_v33, %v105_v10  ;;  %v2202_v54 = vmul.f32 -1.442695, %v464_v48 }
 0x118   :  { %849 = vperm.xlu0 %2441, %v2599_v56   ;;  %v647_v12 = vadd.f32 1.0, %v2605_v8  ;;  %2626 = vrcp.f32 %v646_v0  ;;  %v2607_v16 = vpop.eup %2606  ;;  %v2207_v26 = vmul.f32 -1.442695, %v489_v13 }
 0x119   :  { %2628 = vrcp.f32 %v645_v5  ;;  %v2609_v21 = vpop.eup %2608  ;;  %v2203_v31 = vmul.f32 -1.442695, %v469_v19  ;;  %v638_v33 = vadd.f32 1.0, %v2607_v16 }
 0x11a   :  { %2630 = vrcp.f32 %v648_v9  ;;  %v637_v35 = vadd.f32 1.0, %v2609_v21 }
 0x11b   :  { %2632 = vrcp.f32 %v647_v12 }
 0x11c   :  { %2634 = vpow2.f32 %v2206_v15 }
 0x11d   :  { %v2611_v25 = vpop.eup %2610  ;;  %2636 = vpow2.f32 %v2205_v20 }
 0x11e   :  { %v2613_v27 = vpop.eup %2612  ;;  %934 = vperm.xlu1 %2440, %v2611_v25   ;;  %2638 = vpow2.f32 %v2208_v23  ;;  %v2444_v25 = vld [vmem:[%s3847_s4 + $0x4] ss:$12 sps:$4 sm:$0xff]  }
 0x11f   :  { %v2615_v4 = vpop.eup %2614  ;;  %929 = vperm.xlu0 %2441, %v2613_v27   ;;  %2640 = vpow2.f32 %v2207_v26  ;;  %1610 = vmatprep.mubr.bf16.mxu1 %v2444_v25 }
 0x120   :  { %v2617_v32 = vpop.eup %2616  ;;  %2642 = vpow2.f32 %v2204_v28 }
 0x121   :  { %v2619_v44 = vpop.eup %2618  ;;  %2644 = vpow2.f32 %v2203_v31  ;;  %v636_v41 = vadd.f32 1.0, %v2617_v32  ;;  %v767_v32 = vld [vmem:[%s3848_s3 + $0xf0] sm:$0xff] }
 0x122   :  { %v2621_v36 = vpop.eup %2620  ;;  %944 = vperm.xlu1 %2440, %v2615_v4   ;;  %2646 = vrcp.f32 %v638_v33  ;;  %v635_v42 = vadd.f32 1.0, %v2619_v44  ;;  %v768_v33 = vld [vmem:[%s3848_s3 + $0xf8] sm:$0xff] }
 0x123   :  { %v2623_v38 = vpop.eup %2622  ;;  %939 = vperm.xlu0 %2441, %v2621_v36   ;;  %2648 = vrcp.f32 %v637_v35  ;;  %v765_v35 = vld [vmem:[%s3848_s3 + $0xe0] sm:$0xff]  ;;  %v766_v36 = vld [vmem:[%s3848_s3 + $0xe8] sm:$0xff] }
 0x124   :  { %v2625_v43 = vpop.eup %2624  ;;  %2650 = vpow2.f32 %v2186_v37  ;;  %v764_v37 = vld [vmem:[%s3848_s3 + $0xd8] sm:$0xff] }
 0x125   :  { %v2627_v45 = vpop.eup %2626  ;;  %2652 = vpow2.f32 %v2185_v39 }
 0x126   :  { %954 = vperm.xlu1 %2440, %v2623_v38   ;;  %v2629_v18 = vpop.eup %2628  ;;  %2654 = vrcp.f32 %v636_v41 }
 0x127   :  { %949 = vperm.xlu0 %2441, %v2625_v43   ;;  %v2631_v47 = vpop.eup %2630  ;;  %2656 = vrcp.f32 %v635_v42 }
 0x128   :  { %v2633_v49 = vpop.eup %2632  ;;  %2658 = vpow2.f32 %v2202_v54  ;;  %v758_v54 = vld [vmem:[%s3848_s3 + $0xa8] sm:$0xff] }
 0x129   :  { %v2635_v24 = vpop.eup %2634  ;;  %2660 = vpow2.f32 %v2201_v46  ;;  %v763_v46 = vld [vmem:[%s3848_s3 + $0xd0] sm:$0xff] }
 0x12a   :  { %964 = vperm.xlu1 %2440, %v2627_v45   ;;  %v2637_v59 = vpop.eup %2636  ;;  %v654_v51 = vadd.f32 1.0, %v2635_v24  ;;  %v760_v24 = vld [vmem:[%s3848_s3 + $0xb8] sm:$0xff] }
 0x12b   :  { %959 = vperm.xlu0 %2441, %v2629_v18   ;;  %v2639_v52 = vpop.eup %2638  ;;  %v653_v53 = vadd.f32 1.0, %v2637_v59 }
 0x12c   :  { %v2641_v55 = vpop.eup %2640  ;;  %2662 = vrcp.f32 %v654_v51  ;;  %v656_v56 = vadd.f32 1.0, %v2639_v52  ;;  %v757_v52 = vld [vmem:[%s3848_s3 + $0xa0] sm:$0xff] }
 0x12d   :  { %v2643_v57 = vpop.eup %2642  ;;  %2664 = vrcp.f32 %v653_v53  ;;  %v655_v58 = vadd.f32 1.0, %v2641_v55 }
 0x12e   :  { %974 = vperm.xlu1 %2440, %v2631_v47   ;;  %v2645_v60 = vpop.eup %2644  ;;  %2666 = vrcp.f32 %v656_v56  ;;  %v652_v0 = vadd.f32 1.0, %v2643_v57  ;;  %v754_v56 = vld [vmem:[%s3848_s3 + $0x88] sm:$0xff] }
 0x12f   :  { %969 = vperm.xlu0 %2441, %v2633_v49   ;;  %v2647_v61 = vpop.eup %2646  ;;  %v651_v2 = vadd.f32 1.0, %v2645_v60  ;;  %2668 = vrcp.f32 %v655_v58  ;;  %v759_v58 = vld [vmem:[%s3848_s3 + $0xb0] sm:$0xff] }
 0x130   :  { %v2649_v62 = vpop.eup %2648  ;;  %2670 = vrcp.f32 %v652_v0 }
 0x131   :  { %v2651_v1 = vpop.eup %2650  ;;  %2672 = vrcp.f32 %v651_v2 }
 0x132   :  { %924 = vperm.xlu1 %2440, %v2647_v61   ;;  %v2653_v3 = vpop.eup %2652  ;;  %v634_v7 = vadd.f32 1.0, %v2651_v1 }
 0x133   :  { %919 = vperm.xlu0 %2441, %v2649_v62   ;;  %v2655_v5 = vpop.eup %2654  ;;  %v633_v9 = vadd.f32 1.0, %v2653_v3  ;;  %v756_v62 = vld [vmem:[%s3848_s3 + $0x98] sm:$0xff]  ;;  %v753_v3 = vld [vmem:[%s3848_s3 + $0x80] sm:$0xff] }
 0x134   :  { %v2657_v6 = vpop.eup %2656  ;;  %2674 = vrcp.f32 %v634_v7 }
 0x135   :  { %v2659_v8 = vpop.eup %2658  ;;  %2676 = vrcp.f32 %v633_v9  ;;  %v755_v9 = vld [vmem:[%s3848_s3 + $0x90] sm:$0xff] }
 0x136   :  { %914 = vperm.xlu1 %2440, %v2655_v5   ;;  %v2661_v10 = vpop.eup %2660  ;;  %v650_v11 = vadd.f32 1.0, %v2659_v8  ;;  %v750_v8 = vld [vmem:[%s3848_s3 + $0x68] sm:$0xff] }
 0x137   :  { %909 = vperm.xlu0 %2441, %v2657_v6   ;;  %v649_v13 = vadd.f32 1.0, %v2661_v10 }
 0x138   :  { %2678 = vrcp.f32 %v650_v11 }
 0x139   :  { %v2663_v12 = vpop.eup %2662  ;;  %2680 = vrcp.f32 %v649_v13  ;;  %v752_v13 = vld [vmem:[%s3848_s3 + $0x78] sm:$0xff] }
 0x13a   :  { %v2665_v14 = vpop.eup %2664  ;;  %1004 = vperm.xlu1 %2440, %v2663_v12  }
 0x13b   :  { %v2667_v15 = vpop.eup %2666  ;;  %999 = vperm.xlu0 %2441, %v2665_v14  }
 0x13c   :  { %v2669_v16 = vpop.eup %2668 }
 0x13d   :  { %v2671_v17 = vpop.eup %2670 }
 0x13e   :  { %1014 = vperm.xlu1 %2440, %v2667_v15   ;;  %v2673_v19 = vpop.eup %2672 }
 0x13f   :  { %1009 = vperm.xlu0 %2441, %v2669_v16  }
 0x141   :  { %v2675_v20 = vpop.eup %2674 }
 0x142   :  { %994 = vperm.xlu1 %2440, %v2671_v17   ;;  %v2677_v21 = vpop.eup %2676  ;;  %v749_v17 = vld [vmem:[%s3848_s3 + $0x60] sm:$0xff] }
 0x143   :  { %989 = vperm.xlu0 %2441, %v2673_v19  }
 0x145   :  { %v2679_v22 = vpop.eup %2678 }
 0x146   :  { %904 = vperm.xlu1 %2440, %v2675_v20   ;;  %v2681_v23 = vpop.eup %2680 }
 0x147   :  { %899 = vperm.xlu0 %2441, %v2677_v21   ;;  %v748_v21 = vld [vmem:[%s3848_s3 + $0x58] sm:$0xff] }
 0x14a   :  { %984 = vperm.xlu1 %2440, %v2679_v22   ;;  %v751_v22 = vld [vmem:[%s3848_s3 + $0x70] sm:$0xff] }
 0x14b   :  { %979 = vperm.xlu0 %2441, %v2681_v23  }
 0x176   :  { %v3056_v26 = vpop.permute.xlu1 %864 }
 0x177   :  { %v860_v27 = vpop.permute.xlu0 %859  ;;  %v1036_v10 = vmul.f32 %v3056_v26, %v756_v62  ;;  %v1035_v20 = vmul.f32 %v3056_v26, %v755_v9  ;;  %v747_v26 = vld [vmem:[%s3848_s3 + $0x50] sm:$0xff] }
 0x178   :  { %v1034_v5 = vmul.f32 %v860_v27, %v754_v56  ;;  %v1033_v11 = vmul.f32 %v860_v27, %v753_v3  ;;  %v746_v27 = vld [vmem:[%s3848_s3 + $0x48] sm:$0xff]  ;;  %v799_v3 = vld [vmem:[%s3848_s3 + $0x1f0] sm:$0xff] }
 0x17a   :  { %v875_v63 = vpop.permute.xlu1 %874  ;;  %v1106_v15 = vpack.c.bf16 %v1036_v10, %v1034_v5  ;;  %v1105_v25 = vpack.c.bf16 %v1035_v20, %v1033_v11  ;;  %v800_v5 = vld [vmem:[%s3848_s3 + $0x1f8] sm:$0xff]  ;;  %v793_v11 = vld [vmem:[%s3848_s3 + $0x1c0] sm:$0xff] }
 0x17b   :  { %v870_v28 = vpop.permute.xlu0 %869  ;;  %v1040_v60 = vmul.f32 %v875_v63, %v760_v24  ;;  %v1039_v7 = vmul.f32 %v875_v63, %v759_v58 }
 0x17c   :  { %v1038_v53 = vmul.f32 %v870_v28, %v758_v54  ;;  %v1037_v0 = vmul.f32 %v870_v28, %v757_v52  ;;  %v737_v52 = vld [vmem:[%s3848_s3] sm:$0xff] }
 0x17e   :  { %v885_v4 = vpop.permute.xlu1 %884  ;;  %v1108_v6 = vpack.c.bf16 %v1040_v60, %v1038_v53  ;;  %v1107_v12 = vpack.c.bf16 %v1039_v7, %v1037_v0 }
 0x17f   :  { %v3058_v29 = vpop.permute.xlu0 %839  ;;  %v1044_v18 = vmul.f32 %v885_v4, %v764_v37  ;;  %v1043_v57 = vmul.f32 %v885_v4, %v763_v46 }
 0x182   :  { %v3060_v30 = vpop.permute.xlu1 %844 }
 0x183   :  { %v895_v31 = vpop.permute.xlu0 %894  ;;  %v1028_v28 = vmul.f32 %v3060_v30, %v748_v21 }
 0x184   :  { %v1047_v48 = vmul.f32 %v895_v31, %v767_v32  ;;  %v1048_v39 = vmul.f32 %v895_v31, %v768_v33  ;;  %v744_v32 = vld [vmem:[%s3848_s3 + $0x38] sm:$0xff]  ;;  %v745_v33 = vld [vmem:[%s3848_s3 + $0x40] sm:$0xff] }
 0x186   :  { %v880_v44 = vpop.permute.xlu1 %879 }
 0x187   :  { %v890_v38 = vpop.permute.xlu0 %889  ;;  %v1042_v41 = vmul.f32 %v880_v44, %v762_v34  ;;  %v1041_v59 = vmul.f32 %v880_v44, %v761_v40  ;;  %v1026_v34 = vmul.f32 %v3058_v29, %v746_v27 }
 0x188   :  { %v1045_v42 = vmul.f32 %v890_v38, %v765_v35  ;;  %v1046_v43 = vmul.f32 %v890_v38, %v766_v36  ;;  %v1027_v35 = vmul.f32 %v3060_v30, %v747_v26  ;;  %v742_v36 = vld [vmem:[%s3848_s3 + $0x28] sm:$0xff]  ;;  %v741_v30 = vld [vmem:[%s3848_s3 + $0x20] sm:$0xff] }
 0x189   :  { %v1110_v55 = vpack.c.bf16 %v1044_v18, %v1042_v41  ;;  %v1109_v1 = vpack.c.bf16 %v1043_v57, %v1041_v59  ;;  %v1102_v38 = vpack.c.bf16 %v1028_v28, %v1026_v34  ;;  %v1025_v41 = vmul.f32 %v3058_v29, %v745_v33  ;;  %v738_v29 = vld [vmem:[%s3848_s3 + $0x8] sm:$0xff] }
 0x18a   :  { %v855_v45 = vpop.permute.xlu1 %854  ;;  %v1111_v47 = vpack.c.bf16 %v1047_v48, %v1045_v42  ;;  %v1112_v49 = vpack.c.bf16 %v1048_v39, %v1046_v43  ;;  %v743_v39 = vld [vmem:[%s3848_s3 + $0x30] sm:$0xff]  ;;  %v740_v42 = vld [vmem:[%s3848_s3 + $0x18] sm:$0xff] }
 0x18b   :  { %v3092_v51 = vpop.permute.xlu0 %829  ;;  %v1032_v23 = vmul.f32 %v855_v45, %v752_v13  ;;  %v1031_v31 = vmul.f32 %v855_v45, %v751_v22  ;;  %v1101_v45 = vpack.c.bf16 %v1027_v35, %v1025_v41  ;;  %v788_v35 = vld [vmem:[%s3848_s3 + $0x198] sm:$0xff] }
 0x18c   :  { %1578 = vmatprep.subr.bf16.mxu1 %v1112_v49  ;;  %v1022_v43 = vmul.f32 %v3092_v51, %v742_v36  ;;  %v739_v49 = vld [vmem:[%s3848_s3 + $0x10] sm:$0xff]  ;;  %v1021_v59 = vmul.f32 %v3092_v51, %v741_v30 }
 0x18d   :  { %1579 = vmatpush1.bf16.msra.mxu1 %v1111_v47 }
 0x18e   :  { %v835_v61 = vpop.permute.xlu1 %834  ;;  %1580 = vmatprep.subr.bf16.mxu1 %v1110_v55 }
 0x18f   :  { %v3106_v2 = vpop.permute.xlu0 %819  ;;  %v1024_v40 = vmul.f32 %v835_v61, %v744_v32  ;;  %v1023_v46 = vmul.f32 %v835_v61, %v743_v39  ;;  %v791_v32 = vld [vmem:[%s3848_s3 + $0x1b0] sm:$0xff]  ;;  %v785_v39 = vld [vmem:[%s3848_s3 + $0x180] sm:$0xff] }
 0x190   :  { %v1018_v53 = vmul.f32 %v3106_v2, %v738_v29  ;;  %v1017_v61 = vmul.f32 %v3106_v2, %v737_v52  ;;  %v797_v2 = vld [vmem:[%s3848_s3 + $0x1e0] sm:$0xff]  ;;  %v778_v52 = vld [vmem:[%s3848_s3 + $0x148] sm:$0xff] }
 0x191   :  { %1581 = vmatpush1.bf16.msra.mxu1 %v1109_v1  ;;  %v1100_v47 = vpack.c.bf16 %v1024_v40, %v1022_v43  ;;  %v1099_v56 = vpack.c.bf16 %v1023_v46, %v1021_v59  ;;  %v794_v1 = vld [vmem:[%s3848_s3 + $0x1c8] sm:$0xff]  ;;  %v787_v43 = vld [vmem:[%s3848_s3 + $0x190] sm:$0xff]  ;;  %v784_v46 = vld [vmem:[%s3848_s3 + $0x178] sm:$0xff] }
 0x192   :  { %1582 = vmatprep.subr.bf16.mxu1 %v1108_v6  ;;  %v825_v16 = vpop.permute.xlu1 %824  ;;  %v798_v6 = vld [vmem:[%s3848_s3 + $0x1e8] sm:$0xff] }
 0x193   :  { %v850_v14 = vpop.permute.xlu0 %849  ;;  %v1020_v24 = vmul.f32 %v825_v16, %v740_v42  ;;  %v1019_v57 = vmul.f32 %v825_v16, %v739_v49  ;;  %v790_v16 = vld [vmem:[%s3848_s3 + $0x1a8] sm:$0xff]  ;;  %v781_v49 = vld [vmem:[%s3848_s3 + $0x160] sm:$0xff] }
 0x194   :  { %v1030_v19 = vmul.f32 %v850_v14, %v750_v8  ;;  %v1029_v63 = vmul.f32 %v850_v14, %v749_v17  ;;  %v796_v8 = vld [vmem:[%s3848_s3 + $0x1d8] sm:$0xff]  ;;  %v795_v17 = vld [vmem:[%s3848_s3 + $0x1d0] sm:$0xff]  ;;  %v782_v42 = vld [vmem:[%s3848_s3 + $0x168] sm:$0xff] }
 0x195   :  { %1583 = vmatpush1.bf16.msra.mxu1 %v1107_v12  ;;  %v1098_v60 = vpack.c.bf16 %v1020_v24, %v1018_v53  ;;  %v1097_v0 = vpack.c.bf16 %v1019_v57, %v1017_v61  ;;  %v815_v61 = vld [vmem:[%s3848_s3 + $0x270] sm:$0xff] }
 0x196   :  { %1584 = vmatprep.subr.bf16.mxu1 %v1106_v15  ;;  %v1104_v4 = vpack.c.bf16 %v1032_v23, %v1030_v19  ;;  %v1103_v37 = vpack.c.bf16 %v1031_v31, %v1029_v63  ;;  %v792_v23 = vld [vmem:[%s3848_s3 + $0x1b8] sm:$0xff]  ;;  %v789_v63 = vld [vmem:[%s3848_s3 + $0x1a0] sm:$0xff] }
 0x199   :  { %1585 = vmatpush1.bf16.msra.mxu1 %v1105_v25  ;;  %v3145_v44 = vpop.permute.xlu1 %934 }
 0x19a   :  { %1586 = vmatprep.subr.bf16.mxu1 %v1104_v4  ;;  %v3151_v48 = vpop.permute.xlu0 %929  ;;  %v786_v4 = vld [vmem:[%s3848_s3 + $0x188] sm:$0xff]  ;;  %v1064_v57 = vmul.f32 %v3145_v44, %v784_v46 }
 0x19b   :  { %v1062_v24 = vmul.f32 %v3151_v48, %v782_v42  ;;  %v770_v46 = vld [vmem:[%s3848_s3 + $0x108] sm:$0xff] }
 0x19d   :  { %1587 = vmatpush1.bf16.msra.mxu1 %v1103_v37  ;;  %v3164_v54 = vpop.permute.xlu1 %944 }
 0x19e   :  { %1588 = vmatprep.subr.bf16.mxu1 %v1102_v38  ;;  %v3169_v18 = vpop.permute.xlu0 %939 }
 0x19f   :  { %v1066_v40 = vmul.f32 %v3169_v18, %v786_v4  ;;  %v1065_v29 = vmul.f32 %v3169_v18, %v785_v39 }
 0x1a1   :  { %1589 = vmatpush1.bf16.msra.mxu1 %v1101_v45  ;;  %v955_v55 = vpop.permute.xlu1 %954  ;;  %v1068_v45 = vmul.f32 %v3164_v54, %v788_v35  ;;  %v808_v35 = vld [vmem:[%s3848_s3 + $0x238] sm:$0xff] }
 0x1a2   :  { %1590 = vmatprep.subr.bf16.mxu1 %v1100_v47  ;;  %v950_v58 = vpop.permute.xlu0 %949  ;;  %v1072_v33 = vmul.f32 %v955_v55, %v792_v23  ;;  %v1071_v30 = vmul.f32 %v955_v55, %v791_v32  ;;  %v783_v55 = vld [vmem:[%s3848_s3 + $0x170] sm:$0xff]  ;;  %v806_v23 = vld [vmem:[%s3848_s3 + $0x228] sm:$0xff] }
 0x1a3   :  { %v1070_v26 = vmul.f32 %v950_v58, %v790_v16  ;;  %v1069_v36 = vmul.f32 %v950_v58, %v789_v63  ;;  %v1122_v59 = vpack.c.bf16 %v1068_v45, %v1066_v40  ;;  %v780_v58 = vld [vmem:[%s3848_s3 + $0x158] sm:$0xff] }
 0x1a4   :  { %v772_v45 = vld [vmem:[%s3848_s3 + $0x118] sm:$0xff] }
 0x1a5   :  { %1591 = vmatpush1.bf16.msra.mxu1 %v1099_v56  ;;  %v965_v62 = vpop.permute.xlu1 %964  ;;  %v1124_v41 = vpack.c.bf16 %v1072_v33, %v1070_v26  ;;  %v1123_v47 = vpack.c.bf16 %v1071_v30, %v1069_v36  ;;  %v1067_v56 = vmul.f32 %v3164_v54, %v787_v43  ;;  %v811_v26 = vld [vmem:[%s3848_s3 + $0x250] sm:$0xff] }
 0x1a6   :  { %1592 = vmatprep.subr.bf16.mxu1 %v1098_v60  ;;  %v960_v51 = vpop.permute.xlu0 %959  ;;  %v1076_v19 = vmul.f32 %v965_v62, %v796_v8  ;;  %v1075_v31 = vmul.f32 %v965_v62, %v795_v17  ;;  %v810_v60 = vld [vmem:[%s3848_s3 + $0x248] sm:$0xff]  ;;  %v1061_v62 = vmul.f32 %v3151_v48, %v781_v49  ;;  %v777_v48 = vld [vmem:[%s3848_s3 + $0x140] sm:$0xff] }
 0x1a7   :  { %v1074_v9 = vmul.f32 %v960_v51, %v794_v1  ;;  %v1073_v25 = vmul.f32 %v960_v51, %v793_v11  ;;  %v1121_v54 = vpack.c.bf16 %v1067_v56, %v1065_v29  ;;  %v816_v51 = vld [vmem:[%s3848_s3 + $0x278] sm:$0xff]  ;;  %v813_v1 = vld [vmem:[%s3848_s3 + $0x260] sm:$0xff]  ;;  %v774_v8 = vld [vmem:[%s3848_s3 + $0x128] sm:$0xff] }
 0x1a9   :  { %1593 = vmatpush1.bf16.msra.mxu1 %v1097_v0  ;;  %v975_v7 = vpop.permute.xlu1 %974  ;;  %v1126_v28 = vpack.c.bf16 %v1076_v19, %v1074_v9  ;;  %v1125_v37 = vpack.c.bf16 %v1075_v31, %v1073_v25  ;;  %v812_v9 = vld [vmem:[%s3848_s3 + $0x258] sm:$0xff]  ;;  %v773_v25 = vld [vmem:[%s3848_s3 + $0x120] sm:$0xff] }
 0x1aa   :  { %v970_v10 = vpop.permute.xlu0 %969  ;;  %v1079_v12 = vmul.f32 %v975_v7, %v799_v3  ;;  %v1080_v13 = vmul.f32 %v975_v7, %v800_v5  ;;  %v814_v3 = vld [vmem:[%s3848_s3 + $0x268] sm:$0xff]  ;;  %v1120_v5 = vpack.c.bf16 %v1064_v57, %v1062_v24 }
 0x1ab   :  { %v1077_v14 = vmul.f32 %v970_v10, %v797_v2  ;;  %v1078_v15 = vmul.f32 %v970_v10, %v798_v6  ;;  %v1063_v6 = vmul.f32 %v3145_v44, %v783_v55  ;;  %v809_v44 = vld [vmem:[%s3848_s3 + $0x240] sm:$0xff] }
 0x1ad   :  { %v1127_v20 = vpack.c.bf16 %v1079_v12, %v1077_v14  ;;  %v1128_v21 = vpack.c.bf16 %v1080_v13, %v1078_v15  ;;  %v3207_v22 = vpop.permute.xlu1 %924  ;;  %v779_v12 = vld [vmem:[%s3848_s3 + $0x150] sm:$0xff]  ;;  %v1119_v17 = vpack.c.bf16 %v1063_v6, %v1061_v62 }
 0x1ae   :  { %v3212_v27 = vpop.permute.xlu0 %919  ;;  %v1060_v7 = vmul.f32 %v3207_v22, %v780_v58  ;;  %v1059_v32 = vmul.f32 %v3207_v22, %v779_v12 }
 0x1af   :  { %1594 = vmatprep.subr.bf16.mxu1 %v1128_v21  ;;  %v1058_v0 = vmul.f32 %v3212_v27, %v778_v52  ;;  %v1057_v19 = vmul.f32 %v3212_v27, %v777_v48  ;;  %v776_v21 = vld [vmem:[%s3848_s3 + $0x138] sm:$0xff] }
 0x1b0   :  { %1595 = vmatpush2.bf16.msra.mxu1 %v1127_v20 }
 0x1b1   :  { %v3223_v34 = vpop.permute.xlu1 %914  ;;  %1596 = vmatprep.subr.bf16.mxu1 %v1126_v28  ;;  %v1118_v20 = vpack.c.bf16 %v1060_v7, %v1058_v0  ;;  %v1117_v22 = vpack.c.bf16 %v1059_v32, %v1057_v19  ;;  %v801_v0 = vld [vmem:[%s3848_s3 + $0x200] sm:$0xff]  ;;  %v2452_v19 = vld [vmem:[%s3847_s4 + $0x30] ss:$12 sps:$4 sm:$0xff]  }
 0x1b2   :  { %v3228_v38 = vpop.permute.xlu0 %909  ;;  %v1056_v39 = vmul.f32 %v3223_v34, %v776_v21  ;;  %v2453_v21 = vld [vmem:[%s3847_s4 + $0x38] ss:$12 sps:$4 sm:$0xff]   ;;  %v2465_v32 = vld [vmem:[%s3847_s4 + $0x80] ss:$12 sps:$4 sm:$0xff]  }
 0x1b3   :  { %v1054_v63 = vmul.f32 %v3228_v38, %v774_v8  ;;  %v1053_v30 = vmul.f32 %v3228_v38, %v773_v25  ;;  %v769_v38 = vld [vmem:[%s3848_s3 + $0x100] sm:$0xff] }
 0x1b4   :  { %1597 = vmatpush2.bf16.msra.mxu1 %v1125_v37  ;;  %v775_v37 = vld [vmem:[%s3848_s3 + $0x130] sm:$0xff] }
 0x1b5   :  { %1598 = vmatprep.subr.bf16.mxu1 %v1124_v41  ;;  %v1005_v53 = vpop.permute.xlu1 %1004  ;;  %v805_v41 = vld [vmem:[%s3848_s3 + $0x220] sm:$0xff]  ;;  %v1116_v29 = vpack.c.bf16 %v1056_v39, %v1054_v63  ;;  %v2457_v63 = vld [vmem:[%s3847_s4 + $0x50] ss:$12 sps:$4 sm:$0xff]  }
 0x1b6   :  { %v1000_v18 = vpop.permute.xlu0 %999  ;;  %v1092_v27 = vmul.f32 %v1005_v53, %v812_v9  ;;  %v1091_v43 = vmul.f32 %v1005_v53, %v811_v26  ;;  %v2458_v25 = vld [vmem:[%s3847_s4 + $0x64] ss:$12 sps:$4 sm:$0xff]   ;;  %v2460_v26 = vld [vmem:[%s3847_s4 + $0x60] ss:$12 sps:$4 sm:$0xff]  }
 0x1b7   :  { %v1090_v10 = vmul.f32 %v1000_v18, %v810_v60  ;;  %v1089_v33 = vmul.f32 %v1000_v18, %v809_v44  ;;  %v771_v18 = vld [vmem:[%s3848_s3 + $0x110] sm:$0xff]  ;;  %v2442_v44 = vld [vmem:[%s3847_s4] ss:$12 sps:$4 sm:$0xff]  }
 0x1b8   :  { %1599 = vmatpush2.bf16.msra.mxu1 %v1123_v47  ;;  %v807_v47 = vld [vmem:[%s3848_s3 + $0x230] sm:$0xff] }
 0x1b9   :  { %1600 = vmatprep.subr.bf16.mxu1 %v1122_v59  ;;  %v1015_v2 = vpop.permute.xlu1 %1014  ;;  %v1134_v40 = vpack.c.bf16 %v1092_v27, %v1090_v10  ;;  %v1055_v59 = vmul.f32 %v3223_v34, %v775_v37  ;;  %v1133_v52 = vpack.c.bf16 %v1091_v43, %v1089_v33  ;;  %v803_v60 = vld [vmem:[%s3848_s3 + $0x210] sm:$0xff]  ;;  %v804_v34 = vld [vmem:[%s3848_s3 + $0x218] sm:$0xff] }
 0x1ba   :  { %v1010_v11 = vpop.permute.xlu0 %1009  ;;  %v1095_v13 = vmul.f32 %v1015_v2, %v815_v61  ;;  %v1096_v14 = vmul.f32 %v1015_v2, %v816_v51  ;;  %v802_v51 = vld [vmem:[%s3848_s3 + $0x208] sm:$0xff]  ;;  %v2468_v33 = vld [vmem:[%s3847_s4 + $0x90] ss:$12 sps:$4 sm:$0xff]   ;;  %v2482_v43 = vld [vmem:[%s3847_s4 + $0xf4] ss:$12 sps:$4 sm:$0xff]  }
 0x1bb   :  { %v1093_v15 = vmul.f32 %v1010_v11, %v813_v1  ;;  %v1094_v16 = vmul.f32 %v1010_v11, %v814_v3  ;;  %v1115_v61 = vpack.c.bf16 %v1055_v59, %v1053_v30  ;;  %v2462_v27 = vld [vmem:[%s3847_s4 + $0x7c] ss:$12 sps:$4 sm:$0xff]   ;;  %v2474_v39 = vld [vmem:[%s3847_s4 + $0xc4] ss:$12 sps:$4 sm:$0xff]   ;;  %v2492_v59 = vld [vmem:[%s3847_s4 + $0x120] ss:$12 sps:$4 sm:$0xff]  }
 0x1bc   :  { %1601 = vmatpush2.bf16.msra.mxu1 %v1121_v54  ;;  %v2472_v37 = vld [vmem:[%s3847_s4 + $0xa8] ss:$12 sps:$4 sm:$0xff]   ;;  %v2480_v30 = vld [vmem:[%s3847_s4 + $0xd8] ss:$12 sps:$4 sm:$0xff]  }
 0x1bd   :  { %1602 = vmatprep.subr.bf16.mxu1 %v1120_v5  ;;  %v1135_v28 = vpack.c.bf16 %v1095_v13, %v1093_v15  ;;  %v1136_v4 = vpack.c.bf16 %v1096_v14, %v1094_v16  ;;  %v995_v31 = vpop.permute.xlu1 %994  ;;  %v2446_v13 = vld [vmem:[%s3847_s4 + $0x1c] ss:$12 sps:$4 sm:$0xff]   ;;  %v2448_v15 = vld [vmem:[%s3847_s4 + $0x18] ss:$12 sps:$4 sm:$0xff]   ;;  %v2450_v16 = vld [vmem:[%s3847_s4 + $0x34] ss:$12 sps:$4 sm:$0xff]  }
 0x1be   :  { %v990_v36 = vpop.permute.xlu0 %989  ;;  %v1088_v49 = vmul.f32 %v995_v31, %v808_v35  ;;  %v1087_v62 = vmul.f32 %v995_v31, %v807_v47  ;;  %v2445_v14 = vld [vmem:[%s3847_s4 + $0x8] ss:$12 sps:$4 sm:$0xff]   ;;  %v2470_v35 = vld [vmem:[%s3847_s4 + $0xac] ss:$12 sps:$4 sm:$0xff]  }
 0x1bf   :  { %v1086_v42 = vmul.f32 %v990_v36, %v806_v23  ;;  %1819 = vmatprep.subr.bf16.mxu0 %v1136_v4  ;;  %v1085_v53 = vmul.f32 %v990_v36, %v805_v41  ;;  %v2456_v23 = vld [vmem:[%s3847_s4 + $0x48] ss:$12 sps:$4 sm:$0xff]   ;;  %v2464_v4 = vld [vmem:[%s3847_s4 + $0x78] ss:$12 sps:$4 sm:$0xff]   ;;  %v2476_v41 = vld [vmem:[%s3847_s4 + $0xc0] ss:$12 sps:$4 sm:$0xff]  }
 0x1c0   :  { %1603 = vmatpush2.bf16.msra.mxu1 %v1119_v17  ;;  %1820 = vmatpush1.bf16.msra.mxu0 %v1135_v28  ;;  %v2449_v17 = vld [vmem:[%s3847_s4 + $0x20] ss:$12 sps:$4 sm:$0xff]   ;;  %v2461_v28 = vld [vmem:[%s3847_s4 + $0x68] ss:$12 sps:$4 sm:$0xff]   ;;  %v2469_v36 = vld [vmem:[%s3847_s4 + $0x98] ss:$12 sps:$4 sm:$0xff]  }
 0x1c1   :  { %1604 = vmatprep.subr.bf16.mxu1 %v1118_v20  ;;  %v905_v24 = vpop.permute.xlu1 %904  ;;  %1821 = vmatprep.subr.bf16.mxu0 %v1134_v40  ;;  %v1132_v56 = vpack.c.bf16 %v1088_v49, %v1086_v42  ;;  %v1131_v5 = vpack.c.bf16 %v1087_v62, %v1085_v53  ;;  %v2454_v20 = vld [vmem:[%s3847_s4 + $0x4c] ss:$12 sps:$4 sm:$0xff]   ;;  %v2466_v31 = vld [vmem:[%s3847_s4 + $0x94] ss:$12 sps:$4 sm:$0xff]   ;;  %v2473_v40 = vld [vmem:[%s3847_s4 + $0xb0] ss:$12 sps:$4 sm:$0xff]  }
 0x1c2   :  { %v900_v55 = vpop.permute.xlu0 %899  ;;  %v1052_v57 = vmul.f32 %v905_v24, %v772_v45  ;;  %v1051_v48 = vmul.f32 %v905_v24, %v771_v18  ;;  %v2478_v42 = vld [vmem:[%s3847_s4 + $0xdc] ss:$12 sps:$4 sm:$0xff]   ;;  %v2481_v45 = vld [vmem:[%s3847_s4 + $0xe0] ss:$12 sps:$4 sm:$0xff]   ;;  %v2485_v47 = vld [vmem:[%s3847_s4 + $0xf8] ss:$12 sps:$4 sm:$0xff]  }
 0x1c3   :  { %v1050_v58 = vmul.f32 %v900_v55, %v770_v46  ;;  %v1049_v54 = vmul.f32 %v900_v55, %v769_v38  ;;  %v2484_v46 = vld [vmem:[%s3847_s4 + $0xf0] ss:$12 sps:$4 sm:$0xff]   ;;  %v2488_v49 = vld [vmem:[%s3847_s4 + $0x108] ss:$12 sps:$4 sm:$0xff]   ;;  %v2496_v55 = vld [vmem:[%s3847_s4 + $0x138] ss:$12 sps:$4 sm:$0xff]  }
 0x1c4   :  { %1605 = vmatpush2.bf16.msra.mxu1 %v1117_v22  ;;  %1822 = vmatpush1.bf16.msra.mxu0 %v1133_v52  ;;  %v2477_v22 = vld [vmem:[%s3847_s4 + $0xc8] ss:$12 sps:$4 sm:$0xff]   ;;  %v2490_v24 = vld [vmem:[%s3847_s4 + $0x124] ss:$12 sps:$4 sm:$0xff]   ;;  %v2497_v18 = vld [vmem:[%s3847_s4 + $0x140] ss:$12 sps:$4 sm:$0xff]  }
 0x1c5   :  { %1606 = vmatprep.subr.bf16.mxu1 %v1116_v29  ;;  %v1114_v1 = vpack.c.bf16 %v1052_v57, %v1050_v58  ;;  %v985_v3 = vpop.permute.xlu1 %984  ;;  %1823 = vmatprep.subr.bf16.mxu0 %v1132_v56  ;;  %v1113_v10 = vpack.c.bf16 %v1051_v48, %v1049_v54  ;;  %v2486_v29 = vld [vmem:[%s3847_s4 + $0x10c] ss:$12 sps:$4 sm:$0xff]   ;;  %v2489_v38 = vld [vmem:[%s3847_s4 + $0x110] ss:$12 sps:$4 sm:$0xff]   ;;  %v2493_v53 = vld [vmem:[%s3847_s4 + $0x128] ss:$12 sps:$4 sm:$0xff]  }
 0x1c6   :  { %v980_v2 = vpop.permute.xlu0 %979  ;;  %v1083_v6 = vmul.f32 %v985_v3, %v803_v60  ;;  %v1084_v7 = vmul.f32 %v985_v3, %v804_v34  ;;  %v2494_v52 = vld [vmem:[%s3847_s4 + $0x13c] ss:$12 sps:$4 sm:$0xff]   ;;  %v2498_v56 = vld [vmem:[%s3847_s4 + $0x154] ss:$12 sps:$4 sm:$0xff]   ;;  %v2502_v58 = vld [vmem:[%s3847_s4 + $0x16c] ss:$12 sps:$4 sm:$0xff]  }
 0x1c7   :  { %v1081_v8 = vmul.f32 %v980_v2, %v801_v0  ;;  %v1082_v9 = vmul.f32 %v980_v2, %v802_v51  ;;  %v2500_v57 = vld [vmem:[%s3847_s4 + $0x150] ss:$12 sps:$4 sm:$0xff]   ;;  %v2501_v60 = vld [vmem:[%s3847_s4 + $0x158] ss:$12 sps:$4 sm:$0xff]   ;;  %v2508_v34 = vld [vmem:[%s3847_s4 + $0x180] ss:$12 sps:$4 sm:$0xff]  }
 0x1c8   :  { %1607 = vmatpush2.bf16.msra.mxu1 %v1115_v61  ;;  %1824 = vmatpush1.bf16.msra.mxu0 %v1131_v5  ;;  %v2504_v61 = vld [vmem:[%s3847_s4 + $0x168] ss:$12 sps:$4 sm:$0xff]   ;;  %v2506_v62 = vld [vmem:[%s3847_s4 + $0x184] ss:$12 sps:$4 sm:$0xff]   ;;  %v2513_v5 = vld [vmem:[%s3847_s4 + $0x1a0] ss:$12 sps:$4 sm:$0xff]  }
 0x1c9   :  { %1608 = vmatprep.subr.bf16.mxu1 %v1114_v1  ;;  %v1129_v11 = vpack.c.bf16 %v1083_v6, %v1081_v8  ;;  %v1130_v12 = vpack.c.bf16 %v1084_v7, %v1082_v9  ;;  %v2505_v54 = vld [vmem:[%s3847_s4 + $0x170] ss:$12 sps:$4 sm:$0xff]   ;;  %v2509_v51 = vld [vmem:[%s3847_s4 + $0x188] ss:$12 sps:$4 sm:$0xff]   ;;  %v2512_v1 = vld [vmem:[%s3847_s4 + $0x198] ss:$12 sps:$4 sm:$0xff]  }
 0x1ca   :  { %v2510_v0 = vld [vmem:[%s3847_s4 + $0x19c] ss:$12 sps:$4 sm:$0xff]   ;;  %v2514_v3 = vld [vmem:[%s3847_s4 + $0x1b4] ss:$12 sps:$4 sm:$0xff]   ;;  %v2518_v2 = vld [vmem:[%s3847_s4 + $0x1cc] ss:$12 sps:$4 sm:$0xff]  }
 0x1cb   :  { %1825 = vmatprep.subr.bf16.mxu0 %v1130_v12  ;;  %v2516_v48 = vld [vmem:[%s3847_s4 + $0x1b0] ss:$12 sps:$4 sm:$0xff]   ;;  %v2517_v6 = vld [vmem:[%s3847_s4 + $0x1b8] ss:$12 sps:$4 sm:$0xff]   ;;  %v2520_v7 = vld [vmem:[%s3847_s4 + $0x1c8] ss:$12 sps:$4 sm:$0xff]  }
 0x1cc   :  { %1609 = vmatpush2.bf16.msra.mxu1 %v1113_v10  ;;  %1826 = vmatpush1.bf16.msra.mxu0 %v1129_v11  ;;  %v2521_v8 = vld [vmem:[%s3847_s4 + $0x1d0] ss:$12 sps:$4 sm:$0xff]  }
 0x1cf   :  { %1611 = vmatmul.mubr.bf16.vlgmr.msra.gmra.mxu1 %v2442_v44  ;;  %2269 = vmatmul.mubr.msk.bf16.vlgmr.msra.gmra.mxu0 %vm1517_vm1, %v2445_v14 }
 0x1d0   :  { %1620 = vmatprep.mubr.bf16.mxu1 %v2446_v13  ;;  %1853 = vmatprep.mubr.bf16.mxu0 %v2682_v50 }
 0x1d7   :  { %1621 = vmatmul.mubr.bf16.gmra.mxu1 %v2448_v15  ;;  %2270 = vmatmul.mubr.msk.bf16.gmra.mxu0 %vm1517_vm1, %v2449_v17 }
 0x1d8   :  { %1630 = vmatprep.mubr.bf16.mxu1 %v2450_v16  ;;  %1863 = vmatprep.mubr.bf16.mxu0 %v2682_v50 }
 0x1df   :  { %1631 = vmatmul.mubr.bf16.gmra.mxu1 %v2452_v19  ;;  %2271 = vmatmul.mubr.msk.bf16.gmra.mxu0 %vm1517_vm1, %v2453_v21 }
 0x1e0   :  { %1640 = vmatprep.mubr.bf16.mxu1 %v2454_v20  ;;  %1873 = vmatprep.mubr.bf16.mxu0 %v2682_v50 }
 0x1e7   :  { %1641 = vmatmul.mubr.bf16.gmra.mxu1 %v2456_v23  ;;  %2272 = vmatmul.mubr.msk.bf16.gmra.mxu0 %vm1517_vm1, %v2457_v63 }
 0x1e8   :  { %1650 = vmatprep.mubr.bf16.mxu1 %v2458_v25  ;;  %1883 = vmatprep.mubr.bf16.mxu0 %v2682_v50 }
 0x1ef   :  { %1651 = vmatmul.mubr.bf16.gmra.mxu1 %v2460_v26  ;;  %2273 = vmatmul.mubr.msk.bf16.gmra.mxu0 %vm1517_vm1, %v2461_v28 }
 0x1f0   :  { %1660 = vmatprep.mubr.bf16.mxu1 %v2462_v27  ;;  %1893 = vmatprep.mubr.bf16.mxu0 %v2682_v50 }
 0x1f7   :  { %1661 = vmatmul.mubr.bf16.gmra.mxu1 %v2464_v4  ;;  %2274 = vmatmul.mubr.msk.bf16.gmra.mxu0 %vm1517_vm1, %v2465_v32 }
 0x1f8   :  { %1670 = vmatprep.mubr.bf16.mxu1 %v2466_v31  ;;  %1903 = vmatprep.mubr.bf16.mxu0 %v2682_v50 }
 0x1ff   :  { %1671 = vmatmul.mubr.bf16.gmra.mxu1 %v2468_v33  ;;  %2275 = vmatmul.mubr.msk.bf16.gmra.mxu0 %vm1517_vm1, %v2469_v36 }
 0x200   :  { %1680 = vmatprep.mubr.bf16.mxu1 %v2470_v35  ;;  %1913 = vmatprep.mubr.bf16.mxu0 %v2682_v50 }
 0x207   :  { %1681 = vmatmul.mubr.bf16.gmra.mxu1 %v2472_v37  ;;  %2276 = vmatmul.mubr.msk.bf16.gmra.mxu0 %vm1517_vm1, %v2473_v40 }
 0x208   :  { %1690 = vmatprep.mubr.bf16.mxu1 %v2474_v39  ;;  %1923 = vmatprep.mubr.bf16.mxu0 %v2682_v50 }
 0x20f   :  { %1691 = vmatmul.mubr.bf16.gmra.mxu1 %v2476_v41  ;;  %2277 = vmatmul.mubr.msk.bf16.gmra.mxu0 %vm1517_vm1, %v2477_v22 }
 0x210   :  { %1700 = vmatprep.mubr.bf16.mxu1 %v2478_v42  ;;  %1933 = vmatprep.mubr.bf16.mxu0 %v2682_v50 }
 0x217   :  { %1701 = vmatmul.mubr.bf16.gmra.mxu1 %v2480_v30  ;;  %2278 = vmatmul.mubr.msk.bf16.gmra.mxu0 %vm1517_vm1, %v2481_v45 }
 0x218   :  { %1710 = vmatprep.mubr.bf16.mxu1 %v2482_v43  ;;  %1943 = vmatprep.mubr.bf16.mxu0 %v2682_v50 }
 0x21f   :  { %1711 = vmatmul.mubr.bf16.gmra.mxu1 %v2484_v46  ;;  %2279 = vmatmul.mubr.msk.bf16.gmra.mxu0 %vm1517_vm1, %v2485_v47 }
 0x220   :  { %1720 = vmatprep.mubr.bf16.mxu1 %v2486_v29  ;;  %1953 = vmatprep.mubr.bf16.mxu0 %v2682_v50 }
 0x227   :  { %1721 = vmatmul.mubr.bf16.gmra.mxu1 %v2488_v49  ;;  %2280 = vmatmul.mubr.msk.bf16.gmra.mxu0 %vm1517_vm1, %v2489_v38 }
 0x228   :  { %1730 = vmatprep.mubr.bf16.mxu1 %v2490_v24  ;;  %1963 = vmatprep.mubr.bf16.mxu0 %v2682_v50 }
 0x22f   :  { %1731 = vmatmul.mubr.bf16.gmra.mxu1 %v2492_v59  ;;  %2281 = vmatmul.mubr.msk.bf16.gmra.mxu0 %vm1517_vm1, %v2493_v53 }
 0x230   :  { %1740 = vmatprep.mubr.bf16.mxu1 %v2494_v52  ;;  %1973 = vmatprep.mubr.bf16.mxu0 %v2682_v50 }
 0x237   :  { %1741 = vmatmul.mubr.bf16.gmra.mxu1 %v2496_v55  ;;  %2282 = vmatmul.mubr.msk.bf16.gmra.mxu0 %vm1517_vm1, %v2497_v18 }
 0x238   :  { %1750 = vmatprep.mubr.bf16.mxu1 %v2498_v56  ;;  %1983 = vmatprep.mubr.bf16.mxu0 %v2682_v50 }
 0x23f   :  { %1751 = vmatmul.mubr.bf16.gmra.mxu1 %v2500_v57  ;;  %2283 = vmatmul.mubr.msk.bf16.gmra.mxu0 %vm1517_vm1, %v2501_v60 }
 0x240   :  { %1760 = vmatprep.mubr.bf16.mxu1 %v2502_v58  ;;  %1993 = vmatprep.mubr.bf16.mxu0 %v2682_v50 }
 0x247   :  { %1761 = vmatmul.mubr.bf16.gmra.mxu1 %v2504_v61  ;;  %2284 = vmatmul.mubr.msk.bf16.gmra.mxu0 %vm1517_vm1, %v2505_v54 }
 0x248   :  { %1770 = vmatprep.mubr.bf16.mxu1 %v2506_v62  ;;  %2003 = vmatprep.mubr.bf16.mxu0 %v2682_v50 }
 0x24f   :  { %1771 = vmatmul.mubr.bf16.gmra.mxu1 %v2508_v34  ;;  %2285 = vmatmul.mubr.msk.bf16.gmra.mxu0 %vm1517_vm1, %v2509_v51 }
 0x250   :  { %1780 = vmatprep.mubr.bf16.mxu1 %v2510_v0  ;;  %2013 = vmatprep.mubr.bf16.mxu0 %v2682_v50 }
 0x257   :  { %1781 = vmatmul.mubr.bf16.gmra.mxu1 %v2512_v1  ;;  %2286 = vmatmul.mubr.msk.bf16.gmra.mxu0 %vm1517_vm1, %v2513_v5 }
 0x258   :  { %1790 = vmatprep.mubr.bf16.mxu1 %v2514_v3  ;;  %2023 = vmatprep.mubr.bf16.mxu0 %v2682_v50 }
 0x25f   :  { %1791 = vmatmul.mubr.bf16.gmra.mxu1 %v2516_v48  ;;  %2287 = vmatmul.mubr.msk.bf16.gmra.mxu0 %vm1517_vm1, %v2517_v6 }
 0x260   :  { %1800 = vmatprep.mubr.bf16.mxu1 %v2518_v2  ;;  %2033 = vmatprep.mubr.bf16.mxu0 %v2682_v50 }
 0x267   :  { %1801 = vmatmul.mubr.bf16.gmra.mxu1 %v2520_v7  ;;  %2288 = vmatmul.mubr.msk.bf16.gmra.mxu0 %vm1517_vm1, %v2521_v8 }
 0x28f   :  { %v1612_v9 = vpop.f32.mrf.mxu1  ;;  %v1845_v10 = vpop.f32.mrf.mxu0 }
 0x290   :  { %v1846_v12 = vadd.f32 %v1845_v10, %v1612_v9 }
 0x291   :  { %v1614_v11 = vpop.f32.mrf.mxu1  ;;  %v1847_v44 = vpop.f32.mrf.mxu0 }
 0x292   :  { %2044 = vst [vmem:[%s3849_s5] sm:$0xff] %v1846_v12  ;;  %v1848_v50 = vadd.f32 %v1847_v44, %v1614_v11 }
 0x293   :  { %v1616_v13 = vpop.f32.mrf.mxu1  ;;  %v1849_v14 = vpop.f32.mrf.mxu0 }
 0x294   :  { %2046 = vst.msk [vmem:[%s3849_s5 + $0x8] sm:$0xff] %vm2045_vm2, %v1848_v50  ;;  %v1850_v16 = vadd.f32 %v1849_v14, %v1616_v13 }
 0x295   :  { %v1618_v15 = vpop.f32.mrf.mxu1  ;;  %v1851_v17 = vpop.f32.mrf.mxu0 }
 0x296   :  { %2047 = vst [vmem:[%s3849_s5 + $0x10] sm:$0xff] %v1850_v16  ;;  %v1852_v20 = vadd.f32 %v1851_v17, %v1618_v15 }
 0x297   :  { %v1622_v19 = vpop.f32.mrf.mxu1  ;;  %v1855_v21 = vpop.f32.mrf.mxu0 }
 0x298   :  { %2048 = vst.msk [vmem:[%s3849_s5 + $0x18] sm:$0xff] %vm2045_vm2, %v1852_v20  ;;  %v1856_v25 = vadd.f32 %v1855_v21, %v1622_v19 }
 0x299   :  { %v1624_v23 = vpop.f32.mrf.mxu1  ;;  %v1857_v63 = vpop.f32.mrf.mxu0 }
 0x29a   :  { %2049 = vst [vmem:[%s3849_s5 + $0x20] sm:$0xff] %v1856_v25  ;;  %v1858_v27 = vadd.f32 %v1857_v63, %v1624_v23 }
 0x29b   :  { %v1626_v26 = vpop.f32.mrf.mxu1  ;;  %v1859_v28 = vpop.f32.mrf.mxu0 }
 0x29c   :  { %2050 = vst.msk [vmem:[%s3849_s5 + $0x28] sm:$0xff] %vm2045_vm2, %v1858_v27  ;;  %v1860_v31 = vadd.f32 %v1859_v28, %v1626_v26 }
 0x29d   :  { %v1628_v4 = vpop.f32.mrf.mxu1  ;;  %v1861_v32 = vpop.f32.mrf.mxu0 }
 0x29e   :  { %2051 = vst [vmem:[%s3849_s5 + $0x30] sm:$0xff] %v1860_v31  ;;  %v1862_v35 = vadd.f32 %v1861_v32, %v1628_v4 }
 0x29f   :  { %v1632_v33 = vpop.f32.mrf.mxu1  ;;  %v1865_v36 = vpop.f32.mrf.mxu0 }
 0x2a0   :  { %2052 = vst.msk [vmem:[%s3849_s5 + $0x38] sm:$0xff] %vm2045_vm2, %v1862_v35  ;;  %v1866_v39 = vadd.f32 %v1865_v36, %v1632_v33 }
 0x2a1   :  { %v1634_v37 = vpop.f32.mrf.mxu1  ;;  %v1867_v40 = vpop.f32.mrf.mxu0 }
 0x2a2   :  { %2053 = vst [vmem:[%s3849_s5 + $0x40] sm:$0xff] %v1866_v39  ;;  %v1868_v42 = vadd.f32 %v1867_v40, %v1634_v37 }
 0x2a3   :  { %v1636_v41 = vpop.f32.mrf.mxu1  ;;  %v1869_v22 = vpop.f32.mrf.mxu0 }
 0x2a4   :  { %2054 = vst.msk [vmem:[%s3849_s5 + $0x48] sm:$0xff] %vm2045_vm2, %v1868_v42  ;;  %v1870_v43 = vadd.f32 %v1869_v22, %v1636_v41 }
 0x2a5   :  { %v1638_v30 = vpop.f32.mrf.mxu1  ;;  %v1871_v45 = vpop.f32.mrf.mxu0 }
 0x2a6   :  { %2055 = vst [vmem:[%s3849_s5 + $0x50] sm:$0xff] %v1870_v43  ;;  %v1872_v29 = vadd.f32 %v1871_v45, %v1638_v30 }
 0x2a7   :  { %v1642_v46 = vpop.f32.mrf.mxu1  ;;  %v1875_v47 = vpop.f32.mrf.mxu0 }
 0x2a8   :  { %2056 = vst.msk [vmem:[%s3849_s5 + $0x58] sm:$0xff] %vm2045_vm2, %v1872_v29  ;;  %v1876_v24 = vadd.f32 %v1875_v47, %v1642_v46 }
 0x2a9   :  { %v1644_v49 = vpop.f32.mrf.mxu1  ;;  %v1877_v38 = vpop.f32.mrf.mxu0 }
 0x2aa   :  { %2057 = vst [vmem:[%s3849_s5 + $0x60] sm:$0xff] %v1876_v24  ;;  %v1878_v52 = vadd.f32 %v1877_v38, %v1644_v49 }
 0x2ab   :  { %v1646_v59 = vpop.f32.mrf.mxu1  ;;  %v1879_v53 = vpop.f32.mrf.mxu0 }
 0x2ac   :  { %2058 = vst.msk [vmem:[%s3849_s5 + $0x68] sm:$0xff] %vm2045_vm2, %v1878_v52  ;;  %v1880_v56 = vadd.f32 %v1879_v53, %v1646_v59 }
 0x2ad   :  { %v1648_v55 = vpop.f32.mrf.mxu1  ;;  %v1881_v18 = vpop.f32.mrf.mxu0 }
 0x2ae   :  { %2059 = vst [vmem:[%s3849_s5 + $0x70] sm:$0xff] %v1880_v56  ;;  %v1882_v58 = vadd.f32 %v1881_v18, %v1648_v55 }
 0x2af   :  { %v1652_v57 = vpop.f32.mrf.mxu1  ;;  %v1885_v60 = vpop.f32.mrf.mxu0 }
 0x2b0   :  { %2060 = vst.msk [vmem:[%s3849_s5 + $0x78] sm:$0xff] %vm2045_vm2, %v1882_v58  ;;  %v1886_v62 = vadd.f32 %v1885_v60, %v1652_v57 }
 0x2b1   :  { %v1654_v61 = vpop.f32.mrf.mxu1  ;;  %v1887_v54 = vpop.f32.mrf.mxu0 }
 0x2b2   :  { %2061 = vst [vmem:[%s3849_s5 + $0x80] sm:$0xff] %v1886_v62  ;;  %v1888_v0 = vadd.f32 %v1887_v54, %v1654_v61 }
 0x2b3   :  { %v1656_v34 = vpop.f32.mrf.mxu1  ;;  %v1889_v51 = vpop.f32.mrf.mxu0 }
 0x2b4   :  { %2062 = vst.msk [vmem:[%s3849_s5 + $0x88] sm:$0xff] %vm2045_vm2, %v1888_v0  ;;  %v1890_v3 = vadd.f32 %v1889_v51, %v1656_v34 }
 0x2b5   :  { %v1658_v1 = vpop.f32.mrf.mxu1  ;;  %v1891_v5 = vpop.f32.mrf.mxu0 }
 0x2b6   :  { %2063 = vst [vmem:[%s3849_s5 + $0x90] sm:$0xff] %v1890_v3  ;;  %v1892_v2 = vadd.f32 %v1891_v5, %v1658_v1 }
 0x2b7   :  { %v1662_v48 = vpop.f32.mrf.mxu1  ;;  %v1895_v6 = vpop.f32.mrf.mxu0 }
 0x2b8   :  { %2064 = vst.msk [vmem:[%s3849_s5 + $0x98] sm:$0xff] %vm2045_vm2, %v1892_v2  ;;  %v1896_v8 = vadd.f32 %v1895_v6, %v1662_v48 }
 0x2b9   :  { %v1664_v7 = vpop.f32.mrf.mxu1  ;;  %v1897_v9 = vpop.f32.mrf.mxu0 }
 0x2ba   :  { %2065 = vst [vmem:[%s3849_s5 + $0xa0] sm:$0xff] %v1896_v8  ;;  %v1898_v11 = vadd.f32 %v1897_v9, %v1664_v7 }
 0x2bb   :  { %v1666_v10 = vpop.f32.mrf.mxu1  ;;  %v1899_v12 = vpop.f32.mrf.mxu0 }
 0x2bc   :  { %2066 = vst.msk [vmem:[%s3849_s5 + $0xa8] sm:$0xff] %vm2045_vm2, %v1898_v11  ;;  %v1900_v13 = vadd.f32 %v1899_v12, %v1666_v10 }
 0x2bd   :  { %v1668_v44 = vpop.f32.mrf.mxu1  ;;  %v1901_v50 = vpop.f32.mrf.mxu0 }
 0x2be   :  { %2067 = vst [vmem:[%s3849_s5 + $0xb0] sm:$0xff] %v1900_v13  ;;  %v1902_v15 = vadd.f32 %v1901_v50, %v1668_v44 }
 0x2bf   :  { %v1672_v14 = vpop.f32.mrf.mxu1  ;;  %v1905_v16 = vpop.f32.mrf.mxu0 }
 0x2c0   :  { %2068 = vst.msk [vmem:[%s3849_s5 + $0xb8] sm:$0xff] %vm2045_vm2, %v1902_v15  ;;  %v1906_v19 = vadd.f32 %v1905_v16, %v1672_v14 }
 0x2c1   :  { %v1674_v17 = vpop.f32.mrf.mxu1  ;;  %v1907_v20 = vpop.f32.mrf.mxu0 }
 0x2c2   :  { %2069 = vst [vmem:[%s3849_s5 + $0xc0] sm:$0xff] %v1906_v19  ;;  %v1908_v23 = vadd.f32 %v1907_v20, %v1674_v17 }
 0x2c3   :  { %v1676_v21 = vpop.f32.mrf.mxu1  ;;  %v1909_v25 = vpop.f32.mrf.mxu0 }
 0x2c4   :  { %2070 = vst.msk [vmem:[%s3849_s5 + $0xc8] sm:$0xff] %vm2045_vm2, %v1908_v23  ;;  %v1910_v26 = vadd.f32 %v1909_v25, %v1676_v21 }
 0x2c5   :  { %v1678_v63 = vpop.f32.mrf.mxu1  ;;  %v1911_v27 = vpop.f32.mrf.mxu0 }
 0x2c6   :  { %2071 = vst [vmem:[%s3849_s5 + $0xd0] sm:$0xff] %v1910_v26  ;;  %v1912_v4 = vadd.f32 %v1911_v27, %v1678_v63 }
 0x2c7   :  { %v1682_v28 = vpop.f32.mrf.mxu1  ;;  %v1915_v31 = vpop.f32.mrf.mxu0 }
 0x2c8   :  { %2072 = vst.msk [vmem:[%s3849_s5 + $0xd8] sm:$0xff] %vm2045_vm2, %v1912_v4  ;;  %v1916_v33 = vadd.f32 %v1915_v31, %v1682_v28 }
 0x2c9   :  { %v1684_v32 = vpop.f32.mrf.mxu1  ;;  %v1917_v35 = vpop.f32.mrf.mxu0 }
 0x2ca   :  { %2073 = vst [vmem:[%s3849_s5 + $0xe0] sm:$0xff] %v1916_v33  ;;  %v1918_v37 = vadd.f32 %v1917_v35, %v1684_v32 }
 0x2cb   :  { %v1686_v36 = vpop.f32.mrf.mxu1  ;;  %v1919_v39 = vpop.f32.mrf.mxu0 }
 0x2cc   :  { %2074 = vst.msk [vmem:[%s3849_s5 + $0xe8] sm:$0xff] %vm2045_vm2, %v1918_v37  ;;  %v1920_v41 = vadd.f32 %v1919_v39, %v1686_v36 }
 0x2cd   :  { %v1688_v40 = vpop.f32.mrf.mxu1  ;;  %v1921_v42 = vpop.f32.mrf.mxu0 }
 0x2ce   :  { %2075 = vst [vmem:[%s3849_s5 + $0xf0] sm:$0xff] %v1920_v41  ;;  %v1922_v30 = vadd.f32 %v1921_v42, %v1688_v40 }
 0x2cf   :  { %v1692_v22 = vpop.f32.mrf.mxu1  ;;  %v1925_v43 = vpop.f32.mrf.mxu0 }
 0x2d0   :  { %2076 = vst.msk [vmem:[%s3849_s5 + $0xf8] sm:$0xff] %vm2045_vm2, %v1922_v30  ;;  %v1926_v46 = vadd.f32 %v1925_v43, %v1692_v22 }
 0x2d1   :  { %v1694_v45 = vpop.f32.mrf.mxu1  ;;  %v1927_v29 = vpop.f32.mrf.mxu0 }
 0x2d2   :  { %2077 = vst [vmem:[%s3849_s5 + $0x100] sm:$0xff] %v1926_v46  ;;  %v1928_v49 = vadd.f32 %v1927_v29, %v1694_v45 }
 0x2d3   :  { %v1696_v47 = vpop.f32.mrf.mxu1  ;;  %v1929_v24 = vpop.f32.mrf.mxu0 }
 0x2d4   :  { %2078 = vst.msk [vmem:[%s3849_s5 + $0x108] sm:$0xff] %vm2045_vm2, %v1928_v49  ;;  %v1930_v59 = vadd.f32 %v1929_v24, %v1696_v47 }
 0x2d5   :  { %v1698_v38 = vpop.f32.mrf.mxu1  ;;  %v1931_v52 = vpop.f32.mrf.mxu0 }
 0x2d6   :  { %2079 = vst [vmem:[%s3849_s5 + $0x110] sm:$0xff] %v1930_v59  ;;  %v1932_v55 = vadd.f32 %v1931_v52, %v1698_v38 }
 0x2d7   :  { %v1702_v53 = vpop.f32.mrf.mxu1  ;;  %v1935_v56 = vpop.f32.mrf.mxu0 }
 0x2d8   :  { %2080 = vst.msk [vmem:[%s3849_s5 + $0x118] sm:$0xff] %vm2045_vm2, %v1932_v55  ;;  %v1936_v57 = vadd.f32 %v1935_v56, %v1702_v53 }
 0x2d9   :  { %v1704_v18 = vpop.f32.mrf.mxu1  ;;  %v1937_v58 = vpop.f32.mrf.mxu0 }
 0x2da   :  { %2081 = vst [vmem:[%s3849_s5 + $0x120] sm:$0xff] %v1936_v57  ;;  %v1938_v61 = vadd.f32 %v1937_v58, %v1704_v18 }
 0x2db   :  { %v1706_v60 = vpop.f32.mrf.mxu1  ;;  %v1939_v62 = vpop.f32.mrf.mxu0 }
 0x2dc   :  { %2082 = vst.msk [vmem:[%s3849_s5 + $0x128] sm:$0xff] %vm2045_vm2, %v1938_v61  ;;  %v1940_v34 = vadd.f32 %v1939_v62, %v1706_v60 }
 0x2dd   :  { %v1708_v54 = vpop.f32.mrf.mxu1  ;;  %v1941_v0 = vpop.f32.mrf.mxu0 }
 0x2de   :  { %2083 = vst [vmem:[%s3849_s5 + $0x130] sm:$0xff] %v1940_v34  ;;  %v1942_v1 = vadd.f32 %v1941_v0, %v1708_v54 }
 0x2df   :  { %v1712_v51 = vpop.f32.mrf.mxu1  ;;  %v1945_v3 = vpop.f32.mrf.mxu0 }
 0x2e0   :  { %2084 = vst.msk [vmem:[%s3849_s5 + $0x138] sm:$0xff] %vm2045_vm2, %v1942_v1  ;;  %v1946_v48 = vadd.f32 %v1945_v3, %v1712_v51 }
 0x2e1   :  { %v1714_v5 = vpop.f32.mrf.mxu1  ;;  %v1947_v2 = vpop.f32.mrf.mxu0 }
 0x2e2   :  { %2085 = vst [vmem:[%s3849_s5 + $0x140] sm:$0xff] %v1946_v48  ;;  %v1948_v7 = vadd.f32 %v1947_v2, %v1714_v5 }
 0x2e3   :  { %v1716_v6 = vpop.f32.mrf.mxu1  ;;  %v1949_v8 = vpop.f32.mrf.mxu0 }
 0x2e4   :  { %2086 = vst.msk [vmem:[%s3849_s5 + $0x148] sm:$0xff] %vm2045_vm2, %v1948_v7  ;;  %v1950_v10 = vadd.f32 %v1949_v8, %v1716_v6 }
 0x2e5   :  { %v1718_v9 = vpop.f32.mrf.mxu1  ;;  %v1951_v11 = vpop.f32.mrf.mxu0 }
 0x2e6   :  { %2087 = vst [vmem:[%s3849_s5 + $0x150] sm:$0xff] %v1950_v10  ;;  %v1952_v44 = vadd.f32 %v1951_v11, %v1718_v9 }
 0x2e7   :  { %v1722_v12 = vpop.f32.mrf.mxu1  ;;  %v1955_v13 = vpop.f32.mrf.mxu0 }
 0x2e8   :  { %2088 = vst.msk [vmem:[%s3849_s5 + $0x158] sm:$0xff] %vm2045_vm2, %v1952_v44  ;;  %v1956_v14 = vadd.f32 %v1955_v13, %v1722_v12 }
 0x2e9   :  { %v1724_v50 = vpop.f32.mrf.mxu1  ;;  %v1957_v15 = vpop.f32.mrf.mxu0 }
 0x2ea   :  { %2089 = vst [vmem:[%s3849_s5 + $0x160] sm:$0xff] %v1956_v14  ;;  %v1958_v17 = vadd.f32 %v1957_v15, %v1724_v50 }
 0x2eb   :  { %v1726_v16 = vpop.f32.mrf.mxu1  ;;  %v1959_v19 = vpop.f32.mrf.mxu0 }
 0x2ec   :  { %2090 = vst.msk [vmem:[%s3849_s5 + $0x168] sm:$0xff] %vm2045_vm2, %v1958_v17  ;;  %v1960_v21 = vadd.f32 %v1959_v19, %v1726_v16 }
 0x2ed   :  { %v1728_v20 = vpop.f32.mrf.mxu1  ;;  %v1961_v23 = vpop.f32.mrf.mxu0 }
 0x2ee   :  { %2091 = vst [vmem:[%s3849_s5 + $0x170] sm:$0xff] %v1960_v21  ;;  %v1962_v63 = vadd.f32 %v1961_v23, %v1728_v20 }
 0x2ef   :  { %v1732_v25 = vpop.f32.mrf.mxu1  ;;  %v1965_v26 = vpop.f32.mrf.mxu0 }
 0x2f0   :  { %2092 = vst.msk [vmem:[%s3849_s5 + $0x178] sm:$0xff] %vm2045_vm2, %v1962_v63  ;;  %v1966_v28 = vadd.f32 %v1965_v26, %v1732_v25 }
 0x2f1   :  { %v1734_v27 = vpop.f32.mrf.mxu1  ;;  %v1967_v4 = vpop.f32.mrf.mxu0 }
 0x2f2   :  { %2093 = vst [vmem:[%s3849_s5 + $0x180] sm:$0xff] %v1966_v28  ;;  %v1968_v32 = vadd.f32 %v1967_v4, %v1734_v27 }
 0x2f3   :  { %v1736_v31 = vpop.f32.mrf.mxu1  ;;  %v1969_v33 = vpop.f32.mrf.mxu0 }
 0x2f4   :  { %2094 = vst.msk [vmem:[%s3849_s5 + $0x188] sm:$0xff] %vm2045_vm2, %v1968_v32  ;;  %v1970_v36 = vadd.f32 %v1969_v33, %v1736_v31 }
 0x2f5   :  { %v1738_v35 = vpop.f32.mrf.mxu1  ;;  %v1971_v37 = vpop.f32.mrf.mxu0 }
 0x2f6   :  { %2095 = vst [vmem:[%s3849_s5 + $0x190] sm:$0xff] %v1970_v36  ;;  %v1972_v40 = vadd.f32 %v1971_v37, %v1738_v35 }
 0x2f7   :  { %v1742_v39 = vpop.f32.mrf.mxu1  ;;  %v1975_v41 = vpop.f32.mrf.mxu0 }
 0x2f8   :  { %2096 = vst.msk [vmem:[%s3849_s5 + $0x198] sm:$0xff] %vm2045_vm2, %v1972_v40  ;;  %v1976_v22 = vadd.f32 %v1975_v41, %v1742_v39 }
 0x2f9   :  { %v1744_v42 = vpop.f32.mrf.mxu1  ;;  %v1977_v30 = vpop.f32.mrf.mxu0 }
 0x2fa   :  { %2097 = vst [vmem:[%s3849_s5 + $0x1a0] sm:$0xff] %v1976_v22  ;;  %v1978_v45 = vadd.f32 %v1977_v30, %v1744_v42 }
 0x2fb   :  { %v1746_v43 = vpop.f32.mrf.mxu1  ;;  %v1979_v46 = vpop.f32.mrf.mxu0 }
 0x2fc   :  { %2098 = vst.msk [vmem:[%s3849_s5 + $0x1a8] sm:$0xff] %vm2045_vm2, %v1978_v45  ;;  %v1980_v47 = vadd.f32 %v1979_v46, %v1746_v43 }
 0x2fd   :  { %v1748_v29 = vpop.f32.mrf.mxu1  ;;  %v1981_v49 = vpop.f32.mrf.mxu0 }
 0x2fe   :  { %2099 = vst [vmem:[%s3849_s5 + $0x1b0] sm:$0xff] %v1980_v47  ;;  %v1982_v38 = vadd.f32 %v1981_v49, %v1748_v29 }
 0x2ff   :  { %v1752_v24 = vpop.f32.mrf.mxu1  ;;  %v1985_v59 = vpop.f32.mrf.mxu0 }
 0x300   :  { %2100 = vst.msk [vmem:[%s3849_s5 + $0x1b8] sm:$0xff] %vm2045_vm2, %v1982_v38  ;;  %v1986_v53 = vadd.f32 %v1985_v59, %v1752_v24 }
 0x301   :  { %v1754_v52 = vpop.f32.mrf.mxu1  ;;  %v1987_v55 = vpop.f32.mrf.mxu0 }
 0x302   :  { %2101 = vst [vmem:[%s3849_s5 + $0x1c0] sm:$0xff] %v1986_v53  ;;  %v1988_v18 = vadd.f32 %v1987_v55, %v1754_v52 }
 0x303   :  { %v1756_v56 = vpop.f32.mrf.mxu1  ;;  %v1989_v57 = vpop.f32.mrf.mxu0 }
 0x304   :  { %2102 = vst.msk [vmem:[%s3849_s5 + $0x1c8] sm:$0xff] %vm2045_vm2, %v1988_v18  ;;  %v1990_v60 = vadd.f32 %v1989_v57, %v1756_v56 }
 0x305   :  { %v1758_v58 = vpop.f32.mrf.mxu1  ;;  %v1991_v61 = vpop.f32.mrf.mxu0 }
 0x306   :  { %2103 = vst [vmem:[%s3849_s5 + $0x1d0] sm:$0xff] %v1990_v60  ;;  %v1992_v54 = vadd.f32 %v1991_v61, %v1758_v58 }
 0x307   :  { %v1762_v62 = vpop.f32.mrf.mxu1  ;;  %v1995_v34 = vpop.f32.mrf.mxu0 }
 0x308   :  { %2104 = vst.msk [vmem:[%s3849_s5 + $0x1d8] sm:$0xff] %vm2045_vm2, %v1992_v54  ;;  %v1996_v51 = vadd.f32 %v1995_v34, %v1762_v62 }
 0x309   :  { %v1764_v0 = vpop.f32.mrf.mxu1  ;;  %v1997_v1 = vpop.f32.mrf.mxu0 }
 0x30a   :  { %2105 = vst [vmem:[%s3849_s5 + $0x1e0] sm:$0xff] %v1996_v51  ;;  %v1998_v5 = vadd.f32 %v1997_v1, %v1764_v0 }
 0x30b   :  { %v1766_v3 = vpop.f32.mrf.mxu1  ;;  %v1999_v48 = vpop.f32.mrf.mxu0 }
 0x30c   :  { %2106 = vst.msk [vmem:[%s3849_s5 + $0x1e8] sm:$0xff] %vm2045_vm2, %v1998_v5  ;;  %v2000_v6 = vadd.f32 %v1999_v48, %v1766_v3 }
 0x30d   :  { %v1768_v2 = vpop.f32.mrf.mxu1  ;;  %v2001_v7 = vpop.f32.mrf.mxu0 }
 0x30e   :  { %2107 = vst [vmem:[%s3849_s5 + $0x1f0] sm:$0xff] %v2000_v6  ;;  %v2002_v9 = vadd.f32 %v2001_v7, %v1768_v2 }
 0x30f   :  { %v1772_v8 = vpop.f32.mrf.mxu1  ;;  %v2005_v10 = vpop.f32.mrf.mxu0 }
 0x310   :  { %2108 = vst.msk [vmem:[%s3849_s5 + $0x1f8] sm:$0xff] %vm2045_vm2, %v2002_v9  ;;  %v2006_v12 = vadd.f32 %v2005_v10, %v1772_v8 }
 0x311   :  { %v1774_v11 = vpop.f32.mrf.mxu1  ;;  %v2007_v44 = vpop.f32.mrf.mxu0 }
 0x312   :  { %2109 = vst [vmem:[%s3849_s5 + $0x200] sm:$0xff] %v2006_v12  ;;  %v2008_v50 = vadd.f32 %v2007_v44, %v1774_v11 }
 0x313   :  { %v1776_v13 = vpop.f32.mrf.mxu1  ;;  %v2009_v14 = vpop.f32.mrf.mxu0 }
 0x314   :  { %2110 = vst.msk [vmem:[%s3849_s5 + $0x208] sm:$0xff] %vm2045_vm2, %v2008_v50  ;;  %v2010_v16 = vadd.f32 %v2009_v14, %v1776_v13 }
 0x315   :  { %v1778_v15 = vpop.f32.mrf.mxu1  ;;  %v2011_v17 = vpop.f32.mrf.mxu0 }
 0x316   :  { %2111 = vst [vmem:[%s3849_s5 + $0x210] sm:$0xff] %v2010_v16  ;;  %v2012_v20 = vadd.f32 %v2011_v17, %v1778_v15 }
 0x317   :  { %v1782_v19 = vpop.f32.mrf.mxu1  ;;  %v2015_v21 = vpop.f32.mrf.mxu0 }
 0x318   :  { %2112 = vst.msk [vmem:[%s3849_s5 + $0x218] sm:$0xff] %vm2045_vm2, %v2012_v20  ;;  %v2016_v25 = vadd.f32 %v2015_v21, %v1782_v19 }
 0x319   :  { %v1784_v23 = vpop.f32.mrf.mxu1  ;;  %v2017_v63 = vpop.f32.mrf.mxu0 }
 0x31a   :  { %2113 = vst [vmem:[%s3849_s5 + $0x220] sm:$0xff] %v2016_v25  ;;  %v2018_v27 = vadd.f32 %v2017_v63, %v1784_v23 }
 0x31b   :  { %v1786_v26 = vpop.f32.mrf.mxu1  ;;  %v2019_v28 = vpop.f32.mrf.mxu0 }
 0x31c   :  { %2114 = vst.msk [vmem:[%s3849_s5 + $0x228] sm:$0xff] %vm2045_vm2, %v2018_v27  ;;  %v2020_v31 = vadd.f32 %v2019_v28, %v1786_v26 }
 0x31d   :  { %v1788_v4 = vpop.f32.mrf.mxu1  ;;  %v2021_v32 = vpop.f32.mrf.mxu0 }
 0x31e   :  { %2115 = vst [vmem:[%s3849_s5 + $0x230] sm:$0xff] %v2020_v31  ;;  %v2022_v35 = vadd.f32 %v2021_v32, %v1788_v4 }
 0x31f   :  { %v1792_v33 = vpop.f32.mrf.mxu1  ;;  %v2025_v36 = vpop.f32.mrf.mxu0 }
 0x320   :  { %2116 = vst.msk [vmem:[%s3849_s5 + $0x238] sm:$0xff] %vm2045_vm2, %v2022_v35  ;;  %v2026_v39 = vadd.f32 %v2025_v36, %v1792_v33 }
 0x321   :  { %v1794_v37 = vpop.f32.mrf.mxu1  ;;  %v2027_v40 = vpop.f32.mrf.mxu0 }
 0x322   :  { %2117 = vst [vmem:[%s3849_s5 + $0x240] sm:$0xff] %v2026_v39  ;;  %v2028_v42 = vadd.f32 %v2027_v40, %v1794_v37 }
 0x323   :  { %v1796_v41 = vpop.f32.mrf.mxu1  ;;  %v2029_v22 = vpop.f32.mrf.mxu0 }
 0x324   :  { %2118 = vst.msk [vmem:[%s3849_s5 + $0x248] sm:$0xff] %vm2045_vm2, %v2028_v42  ;;  %v2030_v43 = vadd.f32 %v2029_v22, %v1796_v41 }
 0x325   :  { %v1798_v30 = vpop.f32.mrf.mxu1  ;;  %v2031_v45 = vpop.f32.mrf.mxu0 }
 0x326   :  { %2119 = vst [vmem:[%s3849_s5 + $0x250] sm:$0xff] %v2030_v43  ;;  %v2032_v29 = vadd.f32 %v2031_v45, %v1798_v30 }
 0x327   :  { %v1802_v46 = vpop.f32.mrf.mxu1  ;;  %v2035_v47 = vpop.f32.mrf.mxu0 }
 0x328   :  { %2120 = vst.msk [vmem:[%s3849_s5 + $0x258] sm:$0xff] %vm2045_vm2, %v2032_v29  ;;  %v2036_v24 = vadd.f32 %v2035_v47, %v1802_v46 }
 0x329   :  { %v1804_v49 = vpop.f32.mrf.mxu1  ;;  %v2037_v38 = vpop.f32.mrf.mxu0 }
 0x32a   :  { %2121 = vst [vmem:[%s3849_s5 + $0x260] sm:$0xff] %v2036_v24  ;;  %v2038_v52 = vadd.f32 %v2037_v38, %v1804_v49 }
 0x32b   :  { %v1806_v59 = vpop.f32.mrf.mxu1  ;;  %v2039_v53 = vpop.f32.mrf.mxu0 }
 0x32c   :  { %2122 = vst.msk [vmem:[%s3849_s5 + $0x268] sm:$0xff] %vm2045_vm2, %v2038_v52  ;;  %v2040_v56 = vadd.f32 %v2039_v53, %v1806_v59 }
 0x32d   :  { %v1808_v55 = vpop.f32.mrf.mxu1  ;;  %v2041_v18 = vpop.f32.mrf.mxu0 }
 0x32e   :  { %2123 = vst [vmem:[%s3849_s5 + $0x270] sm:$0xff] %v2040_v56  ;;  %v2042_v57 = vadd.f32 %v2041_v18, %v1808_v55 }
 0x330   :  { %2124 = vst.msk [vmem:[%s3849_s5 + $0x278] sm:$0xff] %vm2045_vm2, %v2042_v57 }

</bundles_post_ra>
